<compile_context>
chip_gen: v7x
topology: tpu7x:2x2x1
jax: 0.10.0
libtpu: 0.0.40
codegen_flags: <defaults>
</compile_context>

<pallas_src>
import functools

import jax
import jax.numpy as jnp
from jax.experimental import pallas as pl
from jax.experimental.pallas import tpu as pltpu

# ----------------------------------------------------------------------------
# Synthetic "math_model" (the reference leaves it abstract) — deterministic:
#   dim_x = 4, N = 8, dt = 1/N
#   initial(batch)               -> 0.5 * ones(batch, dim_x)
#   f(t, x, mu, u)               -> 0.5*||u||^2 + 0.5*||x - mu||^2   (per sample)
#   forward_step(t,x,mu,u,dW,dP) -> x + (mu - x + u)*dt + sig*dW + sigp*dP
#   g(x, mu)                     -> 0.5*||x - mu||^2
#   loss(ongoing, terminal)      -> mean(ongoing + terminal)
# ----------------------------------------------------------------------------
DIM_X = 4
N_STEPS = 8
DT = 1.0 / N_STEPS
SIGMA = 0.1
SIGMA_P = 0.05
H1, H2 = 64, 32


def _rollout_kernel(w1a_ref, w1b_ref, w1t_ref, b1_ref,
                    w2_ref, b2_ref, w3_ref, b3_ref,
                    dw_ref, dp_ref,
                    state_ref, ctrl_ref, cex_ref, cost_ref,
                    *, dt, sigma, sigma_p, n_steps):
    # Load all (tiny) weights once; they stay in vregs for every step.
    w1a = w1a_ref[...]          # (D, 64)   x-columns of layer-1 weight
    w1b = w1b_ref[...]          # (D, 64)   mu-columns
    w1t = w1t_ref[...]          # (1, 64)   time-column
    b1 = b1_ref[...]            # (1, 64)
    w2 = w2_ref[...]            # (64, 32)
    b2 = b2_ref[...]            # (1, 32)
    w3 = w3_ref[...]            # (32, D)
    b3 = b3_ref[...]            # (1, D)

    batch = state_ref.shape[1]
    dim_x = state_ref.shape[2]

    # math_model.initial(batch) and the per-sample running-cost accumulator.
    x = jnp.full((batch, dim_x), 0.5, dtype=jnp.float32)
    cost = jnp.zeros((batch, 1), dtype=jnp.float32)
    diff = jnp.zeros((batch, dim_x), dtype=jnp.float32)

    # Fully unrolled time loop (N is small and static): one kernel invocation,
    # sequential dependence carried entirely in registers.
    for i in range(n_steps):
        t = dt * i                                          # Python constant

        # conditional_expectation, i == 0 branch of the reference: batch mean.
        mean_x = jnp.mean(x, axis=0, keepdims=True)         # (1, D)  XLU reduce
        mu = jnp.broadcast_to(mean_x, x.shape)              # (B, D)

        # sequence writebacks: state_seq[i] = x_i, cex_seq[i] = mu_i
        state_ref[i] = x
        cex_ref[i] = mu

        # one_pass MLP on inpt = cat([x, mu, t*ones], 1).  The mu rows are all
        # equal -> rank-1 contribution mean_x @ w1b; t folds into the bias.
        b1_eff = b1 + jnp.float32(t) * w1t                  # (1, 64)
        h = jnp.dot(x, w1a, preferred_element_type=jnp.float32)
        h = h + jnp.dot(mean_x, w1b, preferred_element_type=jnp.float32)
        h = jnp.maximum(h + b1_eff, 0.0)
        h = jnp.maximum(jnp.dot(h, w2, preferred_element_type=jnp.float32) + b2, 0.0)
        u = jnp.dot(h, w3, preferred_element_type=jnp.float32) + b3
        ctrl_ref[i] = u

        # running-cost increment  f(t, x, mu, u) * dt   (lane reduction)
        diff = x - mu
        f_val = (0.5 * jnp.sum(u * u, axis=-1, keepdims=True)
                 + 0.5 * jnp.sum(diff * diff, axis=-1, keepdims=True))
        cost = cost + f_val * dt

        if i < n_steps - 1:
            # Euler forward step of the controlled SDE (skipped at last step).
            x = (x + (mu - x + u) * dt
                 + sigma * dw_ref[i] + sigma_p * dp_ref[i])

    # terminal cost g(x_{N-1}, mu_{N-1}), added once.
    cost = cost + 0.5 * jnp.sum(diff * diff, axis=-1, keepdims=True)
    cost_ref[...] = cost


def make_rollout_fn(batch, dim_x):
    kernel = functools.partial(_rollout_kernel, dt=DT, sigma=SIGMA,
                               sigma_p=SIGMA_P, n_steps=N_STEPS)
    vmem = pl.BlockSpec(memory_space=pltpu.MemorySpace.VMEM)  # whole array in VMEM
    return pl.pallas_call(
        kernel,
        out_shape=(
            jax.ShapeDtypeStruct((N_STEPS, batch, dim_x), jnp.float32),  # state
            jax.ShapeDtypeStruct((N_STEPS, batch, dim_x), jnp.float32),  # control
            jax.ShapeDtypeStruct((N_STEPS, batch, dim_x), jnp.float32),  # cex
            jax.ShapeDtypeStruct((batch, 1), jnp.float32),               # total cost
        ),
        in_specs=[vmem] * 10,
        out_specs=(vmem, vmem, vmem, vmem),
    )


def init_params(key):
    """Deterministic PyTorch-style Linear init (uniform(-1/sqrt(fan_in), ...))."""
    ks = jax.random.split(key, 6)
    d_in = 2 * DIM_X + 1

    def lin(kw, kb, fan_in, fan_out):
        bound = 1.0 / float(fan_in) ** 0.5
        w = jax.random.uniform(kw, (fan_in, fan_out), jnp.float32, -bound, bound)
        b = jax.random.uniform(kb, (1, fan_out), jnp.float32, -bound, bound)
        return w, b

    w1, b1 = lin(ks[0], ks[1], d_in, H1)
    w2, b2 = lin(ks[2], ks[3], H1, H2)
    w3, b3 = lin(ks[4], ks[5], H2, DIM_X)
    # pre-split the first layer's weight into x / mu / time blocks (glue).
    w1a, w1b, w1t = w1[:DIM_X], w1[DIM_X:2 * DIM_X], w1[2 * DIM_X:2 * DIM_X + 1]
    return (w1a, w1b, w1t, b1, w2, b2, w3, b3)


@jax.jit
def common_noise_forward(dW, dP, common_noise, params):
    # TODO(synk): signatory.Augment/Path signatures and sklearn Ridge fit/predict
    # (conditional_expectation for i >= 1) have no Pallas equivalent; the i == 0
    # batch-mean branch is used at every step, so `common_noise` is unused here.
    del common_noise
    batch = dW.shape[0]

    # (B, N, D, 1) -> (N, B, D): one-time layout change so the kernel's static
    # per-step index hits a contiguous (B, D) tile.
    # TODO(synk): trailing Brownian dim assumed to be 1 (reference is abstract).
    dWn = jnp.transpose(dW[..., 0], (1, 0, 2)).astype(jnp.float32)
    dPn = jnp.transpose(dP[..., 0], (1, 0, 2)).astype(jnp.float32)

    rollout = make_rollout_fn(batch, DIM_X)
    state_nbd, ctrl_nbd, cex_nbd, total_cost = rollout(*params, dWn, dPn)

    state_seq = jnp.transpose(state_nbd, (1, 0, 2))    # (B, N, D)
    control_seq = jnp.transpose(ctrl_nbd, (1, 0, 2))   # (B, N, D)
    cex_seq = jnp.transpose(cex_nbd, (1, 0, 2))        # (B, N, D)

    loss = jnp.mean(total_cost[:, 0])                  # math_model.loss
    return state_seq, control_seq, cex_seq, loss


def _reference_forward(dW, dP, params):
    """Pure-JAX reference mirroring the PyTorch forward (synthetic math_model)."""
    w1a, w1b, w1t, b1, w2, b2, w3, b3 = params
    w1 = jnp.concatenate([w1a, w1b, w1t], axis=0)
    batch = dW.shape[0]
    x = jnp.full((batch, DIM_X), 0.5, jnp.float32)
    cost = jnp.zeros((batch,), jnp.float32)
    states, ctrls, cexs = [], [], []
    mu = x
    for i in range(N_STEPS):
        t = DT * i
        mu = jnp.broadcast_to(jnp.mean(x, axis=0, keepdims=True), x.shape)
        states.append(x)
        cexs.append(mu)
        inpt = jnp.concatenate(
            [x, mu, jnp.full((batch, 1), t, jnp.float32)], axis=1)
        h = jnp.maximum(inpt @ w1 + b1, 0.0)
        h = jnp.maximum(h @ w2 + b2, 0.0)
        u = h @ w3 + b3
        ctrls.append(u)
        diff = x - mu
        cost = cost + (0.5 * jnp.sum(u * u, -1) + 0.5 * jnp.sum(diff * diff, -1)) * DT
        if i < N_STEPS - 1:
            x = x + (mu - x + u) * DT + SIGMA * dW[:, i, :, 0] + SIGMA_P * dP[:, i, :, 0]
    cost = cost + 0.5 * jnp.sum((x - mu) ** 2, -1)
    return (jnp.stack(states, 1), jnp.stack(ctrls, 1), jnp.stack(cexs, 1),
            jnp.mean(cost))


if __name__ == "__main__":
    key = jax.random.PRNGKey(0)
    kp, kw, kq, kc = jax.random.split(key, 4)
    params = init_params(kp)

    batch = 8
    sqdt = DT ** 0.5
    dW = jax.random.normal(kw, (batch, N_STEPS, DIM_X, 1), jnp.float32) * sqdt
    dP = jax.random.normal(kq, (batch, N_STEPS, DIM_X, 1), jnp.float32) * sqdt
    common_noise = jax.random.normal(kc, (batch, N_STEPS + 1, 1), jnp.float32)

    state_seq, control_seq, cex_seq, loss = common_noise_forward(
        dW, dP, common_noise, params)
    jax.block_until_ready((state_seq, control_seq, cex_seq, loss))

    assert state_seq.shape == (batch, N_STEPS, DIM_X)
    assert control_seq.shape == (batch, N_STEPS, DIM_X)
    assert cex_seq.shape == (batch, N_STEPS, DIM_X)
    assert loss.shape == ()

    # Correctness check against a pure-JAX rollout of the same math model.
    ref_state, ref_ctrl, ref_cex, ref_loss = _reference_forward(dW, dP, params)
    assert jnp.allclose(state_seq, ref_state, rtol=1e-4, atol=1e-4)
    assert jnp.allclose(control_seq, ref_ctrl, rtol=1e-4, atol=1e-4)
    assert jnp.allclose(cex_seq, ref_cex, rtol=1e-4, atol=1e-4)
    assert jnp.allclose(loss, ref_loss, rtol=1e-4, atol=1e-4)

    print("KERNEL_OK")
</pallas_src>

<mosaic_0001>
module attributes {stable_mosaic.version = 11 : i64} {
  func.func @_rollout_kernel(%arg0: memref<4x64xf32, #tpu.memory_space<vmem>>, %arg1: memref<4x64xf32, #tpu.memory_space<vmem>>, %arg2: memref<1x64xf32, #tpu.memory_space<vmem>>, %arg3: memref<1x64xf32, #tpu.memory_space<vmem>>, %arg4: memref<64x32xf32, #tpu.memory_space<vmem>>, %arg5: memref<1x32xf32, #tpu.memory_space<vmem>>, %arg6: memref<32x4xf32, #tpu.memory_space<vmem>>, %arg7: memref<1x4xf32, #tpu.memory_space<vmem>>, %arg8: memref<8x8x4xf32, #tpu.memory_space<vmem>>, %arg9: memref<8x8x4xf32, #tpu.memory_space<vmem>>, %arg10: memref<8x8x4xf32, #tpu.memory_space<vmem>>, %arg11: memref<8x8x4xf32, #tpu.memory_space<vmem>>, %arg12: memref<8x8x4xf32, #tpu.memory_space<vmem>>, %arg13: memref<8x1xf32, #tpu.memory_space<vmem>>) attributes {dimension_semantics = [], scalar_prefetch = 0 : i64, scratch_operands = 0 : i64, tpu.core_type = #tpu.core_type<tc>} {
    %c0 = arith.constant 0 : index
    %c0_0 = arith.constant 0 : index
    %0 = vector.load %arg0[%c0, %c0_0] : memref<4x64xf32, #tpu.memory_space<vmem>>, vector<4x64xf32>
    %c0_1 = arith.constant 0 : index
    %c0_2 = arith.constant 0 : index
    %1 = vector.load %arg1[%c0_1, %c0_2] : memref<4x64xf32, #tpu.memory_space<vmem>>, vector<4x64xf32>
    %c0_3 = arith.constant 0 : index
    %c0_4 = arith.constant 0 : index
    %2 = vector.load %arg2[%c0_3, %c0_4] : memref<1x64xf32, #tpu.memory_space<vmem>>, vector<1x64xf32>
    %c0_5 = arith.constant 0 : index
    %c0_6 = arith.constant 0 : index
    %3 = vector.load %arg3[%c0_5, %c0_6] : memref<1x64xf32, #tpu.memory_space<vmem>>, vector<1x64xf32>
    %c0_7 = arith.constant 0 : index
    %c0_8 = arith.constant 0 : index
    %4 = vector.load %arg4[%c0_7, %c0_8] : memref<64x32xf32, #tpu.memory_space<vmem>>, vector<64x32xf32>
    %c0_9 = arith.constant 0 : index
    %c0_10 = arith.constant 0 : index
    %5 = vector.load %arg5[%c0_9, %c0_10] : memref<1x32xf32, #tpu.memory_space<vmem>>, vector<1x32xf32>
    %c0_11 = arith.constant 0 : index
    %c0_12 = arith.constant 0 : index
    %6 = vector.load %arg6[%c0_11, %c0_12] : memref<32x4xf32, #tpu.memory_space<vmem>>, vector<32x4xf32>
    %c0_13 = arith.constant 0 : index
    %c0_14 = arith.constant 0 : index
    %7 = vector.load %arg7[%c0_13, %c0_14] : memref<1x4xf32, #tpu.memory_space<vmem>>, vector<1x4xf32>
    %cst = arith.constant 5.000000e-01 : f32
    %8 = vector.broadcast %cst : f32 to vector<8x4xf32>
    %cst_15 = arith.constant 0.000000e+00 : f32
    %9 = vector.broadcast %cst_15 : f32 to vector<8x1xf32>
    %cst_16 = arith.constant dense<0.000000e+00> : vector<4xf32>
    %10 = vector.multi_reduction <add>, %8, %cst_16 [0] : vector<8x4xf32> to vector<4xf32>
    %11 = vector.shape_cast %10 : vector<4xf32> to vector<1x4xf32>
    %cst_17 = arith.constant 8.000000e+00 : f32
    %12 = vector.broadcast %cst_17 : f32 to vector<1x4xf32>
    %13 = arith.divf %11, %12 : vector<1x4xf32>
    %14 = vector.shape_cast %13 : vector<1x4xf32> to vector<1x4xf32>
    %15 = vector.broadcast %14 : vector<1x4xf32> to vector<8x4xf32>
    %c0_18 = arith.constant 0 : index
    %c0_19 = arith.constant 0 : index
    %c0_20 = arith.constant 0 : index
    %16 = vector.load %arg10[%c0_18, %c0_19, %c0_20] : memref<8x8x4xf32, #tpu.memory_space<vmem>>, vector<1x8x4xf32>
    %17 = vector.shape_cast %16 : vector<1x8x4xf32> to vector<8x4xf32>
    %18 = vector.shape_cast %8 : vector<8x4xf32> to vector<1x8x4xf32>
    tpu.vector_store %arg10[%c0_18, %c0_19, %c0_20], %18 {strides = array<i32>} : memref<8x8x4xf32, #tpu.memory_space<vmem>>, vector<1x8x4xf32>,
    %c0_21 = arith.constant 0 : index
    %c0_22 = arith.constant 0 : index
    %c0_23 = arith.constant 0 : index
    %19 = vector.load %arg12[%c0_21, %c0_22, %c0_23] : memref<8x8x4xf32, #tpu.memory_space<vmem>>, vector<1x8x4xf32>
    %20 = vector.shape_cast %19 : vector<1x8x4xf32> to vector<8x4xf32>
    %21 = vector.shape_cast %15 : vector<8x4xf32> to vector<1x8x4xf32>
    tpu.vector_store %arg12[%c0_21, %c0_22, %c0_23], %21 {strides = array<i32>} : memref<8x8x4xf32, #tpu.memory_space<vmem>>, vector<1x8x4xf32>,
    %cst_24 = arith.constant 0.000000e+00 : f32
    %22 = vector.broadcast %cst_24 : f32 to vector<1x64xf32>
    %23 = arith.mulf %22, %2 : vector<1x64xf32>
    %24 = arith.addf %3, %23 : vector<1x64xf32>
    %cst_25 = arith.constant dense<0.000000e+00> : vector<8x64xf32>
    %25 = tpu.matmul %8, %0, %cst_25 {dimension_numbers = #tpu.dot_dimension_numbers<[1], [0], [0], [1], [0, 0, 1, 1], [], []>} : vector<8x4xf32>, vector<4x64xf32>, vector<8x64xf32> -> vector<8x64xf32>
    %cst_26 = arith.constant dense<0.000000e+00> : vector<1x64xf32>
    %26 = tpu.matmul %13, %1, %cst_26 {dimension_numbers = #tpu.dot_dimension_numbers<[1], [0], [0], [1], [0, 0, 1, 1], [], []>} : vector<1x4xf32>, vector<4x64xf32>, vector<1x64xf32> -> vector<1x64xf32>
    %27 = vector.broadcast %26 : vector<1x64xf32> to vector<8x64xf32>
    %28 = arith.addf %25, %27 : vector<8x64xf32>
    %29 = vector.broadcast %24 : vector<1x64xf32> to vector<8x64xf32>
    %30 = arith.addf %28, %29 : vector<8x64xf32>
    %cst_27 = arith.constant 0.000000e+00 : f32
    %31 = vector.broadcast %cst_27 : f32 to vector<8x64xf32>
    %32 = arith.maximumf %30, %31 : vector<8x64xf32>
    %cst_28 = arith.constant dense<0.000000e+00> : vector<8x32xf32>
    %33 = tpu.matmul %32, %4, %cst_28 {dimension_numbers = #tpu.dot_dimension_numbers<[1], [0], [0], [1], [0, 0, 1, 1], [], []>} : vector<8x64xf32>, vector<64x32xf32>, vector<8x32xf32> -> vector<8x32xf32>
    %34 = vector.broadcast %5 : vector<1x32xf32> to vector<8x32xf32>
    %35 = arith.addf %33, %34 : vector<8x32xf32>
    %cst_29 = arith.constant 0.000000e+00 : f32
    %36 = vector.broadcast %cst_29 : f32 to vector<8x32xf32>
    %37 = arith.maximumf %35, %36 : vector<8x32xf32>
    %cst_30 = arith.constant dense<0.000000e+00> : vector<8x4xf32>
    %38 = tpu.matmul %37, %6, %cst_30 {dimension_numbers = #tpu.dot_dimension_numbers<[1], [0], [0], [1], [0, 0, 1, 1], [], []>} : vector<8x32xf32>, vector<32x4xf32>, vector<8x4xf32> -> vector<8x4xf32>
    %39 = vector.broadcast %7 : vector<1x4xf32> to vector<8x4xf32>
    %40 = arith.addf %38, %39 : vector<8x4xf32>
    %c0_31 = arith.constant 0 : index
    %c0_32 = arith.constant 0 : index
    %c0_33 = arith.constant 0 : index
    %41 = vector.load %arg11[%c0_31, %c0_32, %c0_33] : memref<8x8x4xf32, #tpu.memory_space<vmem>>, vector<1x8x4xf32>
    %42 = vector.shape_cast %41 : vector<1x8x4xf32> to vector<8x4xf32>
    %43 = vector.shape_cast %40 : vector<8x4xf32> to vector<1x8x4xf32>
    tpu.vector_store %arg11[%c0_31, %c0_32, %c0_33], %43 {strides = array<i32>} : memref<8x8x4xf32, #tpu.memory_space<vmem>>, vector<1x8x4xf32>,
    %44 = arith.subf %8, %15 : vector<8x4xf32>
    %45 = arith.mulf %40, %40 : vector<8x4xf32>
    %cst_34 = arith.constant dense<0.000000e+00> : vector<8xf32>
    %46 = vector.multi_reduction <add>, %45, %cst_34 [1] : vector<8x4xf32> to vector<8xf32>
    %47 = vector.shape_cast %46 : vector<8xf32> to vector<8x1xf32>
    %cst_35 = arith.constant 5.000000e-01 : f32
    %48 = vector.broadcast %cst_35 : f32 to vector<8x1xf32>
    %49 = arith.mulf %48, %47 : vector<8x1xf32>
    %50 = arith.mulf %44, %44 : vector<8x4xf32>
    %cst_36 = arith.constant dense<0.000000e+00> : vector<8xf32>
    %51 = vector.multi_reduction <add>, %50, %cst_36 [1] : vector<8x4xf32> to vector<8xf32>
    %52 = vector.shape_cast %51 : vector<8xf32> to vector<8x1xf32>
    %cst_37 = arith.constant 5.000000e-01 : f32
    %53 = vector.broadcast %cst_37 : f32 to vector<8x1xf32>
    %54 = arith.mulf %53, %52 : vector<8x1xf32>
    %55 = arith.addf %49, %54 : vector<8x1xf32>
    %cst_38 = arith.constant 1.250000e-01 : f32
    %56 = vector.broadcast %cst_38 : f32 to vector<8x1xf32>
    %57 = arith.mulf %55, %56 : vector<8x1xf32>
    %58 = arith.addf %9, %57 : vector<8x1xf32>
    %59 = arith.subf %15, %8 : vector<8x4xf32>
    %60 = arith.addf %59, %40 : vector<8x4xf32>
    %cst_39 = arith.constant 1.250000e-01 : f32
    %61 = vector.broadcast %cst_39 : f32 to vector<8x4xf32>
    %62 = arith.mulf %60, %61 : vector<8x4xf32>
    %63 = arith.addf %8, %62 : vector<8x4xf32>
    %c0_40 = arith.constant 0 : index
    %c0_41 = arith.constant 0 : index
    %c0_42 = arith.constant 0 : index
    %64 = vector.load %arg8[%c0_40, %c0_41, %c0_42] : memref<8x8x4xf32, #tpu.memory_space<vmem>>, vector<1x8x4xf32>
    %65 = vector.shape_cast %64 : vector<1x8x4xf32> to vector<8x4xf32>
    %cst_43 = arith.constant 1.000000e-01 : f32
    %66 = vector.broadcast %cst_43 : f32 to vector<8x4xf32>
    %67 = arith.mulf %66, %65 : vector<8x4xf32>
    %68 = arith.addf %63, %67 : vector<8x4xf32>
    %c0_44 = arith.constant 0 : index
    %c0_45 = arith.constant 0 : index
    %c0_46 = arith.constant 0 : index
    %69 = vector.load %arg9[%c0_44, %c0_45, %c0_46] : memref<8x8x4xf32, #tpu.memory_space<vmem>>, vector<1x8x4xf32>
    %70 = vector.shape_cast %69 : vector<1x8x4xf32> to vector<8x4xf32>
    %cst_47 = arith.constant 5.000000e-02 : f32
    %71 = vector.broadcast %cst_47 : f32 to vector<8x4xf32>
    %72 = arith.mulf %71, %70 : vector<8x4xf32>
    %73 = arith.addf %68, %72 : vector<8x4xf32>
    %cst_48 = arith.constant dense<0.000000e+00> : vector<4xf32>
    %74 = vector.multi_reduction <add>, %73, %cst_48 [0] : vector<8x4xf32> to vector<4xf32>
    %75 = vector.shape_cast %74 : vector<4xf32> to vector<1x4xf32>
    %cst_49 = arith.constant 8.000000e+00 : f32
    %76 = vector.broadcast %cst_49 : f32 to vector<1x4xf32>
    %77 = arith.divf %75, %76 : vector<1x4xf32>
    %78 = vector.shape_cast %77 : vector<1x4xf32> to vector<1x4xf32>
    %79 = vector.broadcast %78 : vector<1x4xf32> to vector<8x4xf32>
    %c1 = arith.constant 1 : index
    %c0_50 = arith.constant 0 : index
    %c0_51 = arith.constant 0 : index
    %80 = vector.load %arg10[%c1, %c0_50, %c0_51] : memref<8x8x4xf32, #tpu.memory_space<vmem>>, vector<1x8x4xf32>
    %81 = vector.shape_cast %80 : vector<1x8x4xf32> to vector<8x4xf32>
    %82 = vector.shape_cast %73 : vector<8x4xf32> to vector<1x8x4xf32>
    tpu.vector_store %arg10[%c1, %c0_50, %c0_51], %82 {strides = array<i32>} : memref<8x8x4xf32, #tpu.memory_space<vmem>>, vector<1x8x4xf32>,
    %c1_52 = arith.constant 1 : index
    %c0_53 = arith.constant 0 : index
    %c0_54 = arith.constant 0 : index
    %83 = vector.load %arg12[%c1_52, %c0_53, %c0_54] : memref<8x8x4xf32, #tpu.memory_space<vmem>>, vector<1x8x4xf32>
    %84 = vector.shape_cast %83 : vector<1x8x4xf32> to vector<8x4xf32>
    %85 = vector.shape_cast %79 : vector<8x4xf32> to vector<1x8x4xf32>
    tpu.vector_store %arg12[%c1_52, %c0_53, %c0_54], %85 {strides = array<i32>} : memref<8x8x4xf32, #tpu.memory_space<vmem>>, vector<1x8x4xf32>,
    %cst_55 = arith.constant 1.250000e-01 : f32
    %86 = vector.broadcast %cst_55 : f32 to vector<1x64xf32>
    %87 = arith.mulf %86, %2 : vector<1x64xf32>
    %88 = arith.addf %3, %87 : vector<1x64xf32>
    %cst_56 = arith.constant dense<0.000000e+00> : vector<8x64xf32>
    %89 = tpu.matmul %73, %0, %cst_56 {dimension_numbers = #tpu.dot_dimension_numbers<[1], [0], [0], [1], [0, 0, 1, 1], [], []>} : vector<8x4xf32>, vector<4x64xf32>, vector<8x64xf32> -> vector<8x64xf32>
    %cst_57 = arith.constant dense<0.000000e+00> : vector<1x64xf32>
    %90 = tpu.matmul %77, %1, %cst_57 {dimension_numbers = #tpu.dot_dimension_numbers<[1], [0], [0], [1], [0, 0, 1, 1], [], []>} : vector<1x4xf32>, vector<4x64xf32>, vector<1x64xf32> -> vector<1x64xf32>
    %91 = vector.broadcast %90 : vector<1x64xf32> to vector<8x64xf32>
    %92 = arith.addf %89, %91 : vector<8x64xf32>
    %93 = vector.broadcast %88 : vector<1x64xf32> to vector<8x64xf32>
    %94 = arith.addf %92, %93 : vector<8x64xf32>
    %cst_58 = arith.constant 0.000000e+00 : f32
    %95 = vector.broadcast %cst_58 : f32 to vector<8x64xf32>
    %96 = arith.maximumf %94, %95 : vector<8x64xf32>
    %cst_59 = arith.constant dense<0.000000e+00> : vector<8x32xf32>
    %97 = tpu.matmul %96, %4, %cst_59 {dimension_numbers = #tpu.dot_dimension_numbers<[1], [0], [0], [1], [0, 0, 1, 1], [], []>} : vector<8x64xf32>, vector<64x32xf32>, vector<8x32xf32> -> vector<8x32xf32>
    %98 = vector.broadcast %5 : vector<1x32xf32> to vector<8x32xf32>
    %99 = arith.addf %97, %98 : vector<8x32xf32>
    %cst_60 = arith.constant 0.000000e+00 : f32
    %100 = vector.broadcast %cst_60 : f32 to vector<8x32xf32>
    %101 = arith.maximumf %99, %100 : vector<8x32xf32>
    %cst_61 = arith.constant dense<0.000000e+00> : vector<8x4xf32>
    %102 = tpu.matmul %101, %6, %cst_61 {dimension_numbers = #tpu.dot_dimension_numbers<[1], [0], [0], [1], [0, 0, 1, 1], [], []>} : vector<8x32xf32>, vector<32x4xf32>, vector<8x4xf32> -> vector<8x4xf32>
    %103 = vector.broadcast %7 : vector<1x4xf32> to vector<8x4xf32>
    %104 = arith.addf %102, %103 : vector<8x4xf32>
    %c1_62 = arith.constant 1 : index
    %c0_63 = arith.constant 0 : index
    %c0_64 = arith.constant 0 : index
    %105 = vector.load %arg11[%c1_62, %c0_63, %c0_64] : memref<8x8x4xf32, #tpu.memory_space<vmem>>, vector<1x8x4xf32>
    %106 = vector.shape_cast %105 : vector<1x8x4xf32> to vector<8x4xf32>
    %107 = vector.shape_cast %104 : vector<8x4xf32> to vector<1x8x4xf32>
    tpu.vector_store %arg11[%c1_62, %c0_63, %c0_64], %107 {strides = array<i32>} : memref<8x8x4xf32, #tpu.memory_space<vmem>>, vector<1x8x4xf32>,
    %108 = arith.subf %73, %79 : vector<8x4xf32>
    %109 = arith.mulf %104, %104 : vector<8x4xf32>
    %cst_65 = arith.constant dense<0.000000e+00> : vector<8xf32>
    %110 = vector.multi_reduction <add>, %109, %cst_65 [1] : vector<8x4xf32> to vector<8xf32>
    %111 = vector.shape_cast %110 : vector<8xf32> to vector<8x1xf32>
    %cst_66 = arith.constant 5.000000e-01 : f32
    %112 = vector.broadcast %cst_66 : f32 to vector<8x1xf32>
    %113 = arith.mulf %112, %111 : vector<8x1xf32>
    %114 = arith.mulf %108, %108 : vector<8x4xf32>
    %cst_67 = arith.constant dense<0.000000e+00> : vector<8xf32>
    %115 = vector.multi_reduction <add>, %114, %cst_67 [1] : vector<8x4xf32> to vector<8xf32>
    %116 = vector.shape_cast %115 : vector<8xf32> to vector<8x1xf32>
    %cst_68 = arith.constant 5.000000e-01 : f32
    %117 = vector.broadcast %cst_68 : f32 to vector<8x1xf32>
    %118 = arith.mulf %117, %116 : vector<8x1xf32>
    %119 = arith.addf %113, %118 : vector<8x1xf32>
    %cst_69 = arith.constant 1.250000e-01 : f32
    %120 = vector.broadcast %cst_69 : f32 to vector<8x1xf32>
    %121 = arith.mulf %119, %120 : vector<8x1xf32>
    %122 = arith.addf %58, %121 : vector<8x1xf32>
    %123 = arith.subf %79, %73 : vector<8x4xf32>
    %124 = arith.addf %123, %104 : vector<8x4xf32>
    %cst_70 = arith.constant 1.250000e-01 : f32
    %125 = vector.broadcast %cst_70 : f32 to vector<8x4xf32>
    %126 = arith.mulf %124, %125 : vector<8x4xf32>
    %127 = arith.addf %73, %126 : vector<8x4xf32>
    %c1_71 = arith.constant 1 : index
    %c0_72 = arith.constant 0 : index
    %c0_73 = arith.constant 0 : index
    %128 = vector.load %arg8[%c1_71, %c0_72, %c0_73] : memref<8x8x4xf32, #tpu.memory_space<vmem>>, vector<1x8x4xf32>
    %129 = vector.shape_cast %128 : vector<1x8x4xf32> to vector<8x4xf32>
    %cst_74 = arith.constant 1.000000e-01 : f32
    %130 = vector.broadcast %cst_74 : f32 to vector<8x4xf32>
    %131 = arith.mulf %130, %129 : vector<8x4xf32>
    %132 = arith.addf %127, %131 : vector<8x4xf32>
    %c1_75 = arith.constant 1 : index
    %c0_76 = arith.constant 0 : index
    %c0_77 = arith.constant 0 : index
    %133 = vector.load %arg9[%c1_75, %c0_76, %c0_77] : memref<8x8x4xf32, #tpu.memory_space<vmem>>, vector<1x8x4xf32>
    %134 = vector.shape_cast %133 : vector<1x8x4xf32> to vector<8x4xf32>
    %cst_78 = arith.constant 5.000000e-02 : f32
    %135 = vector.broadcast %cst_78 : f32 to vector<8x4xf32>
    %136 = arith.mulf %135, %134 : vector<8x4xf32>
    %137 = arith.addf %132, %136 : vector<8x4xf32>
    %cst_79 = arith.constant dense<0.000000e+00> : vector<4xf32>
    %138 = vector.multi_reduction <add>, %137, %cst_79 [0] : vector<8x4xf32> to vector<4xf32>
    %139 = vector.shape_cast %138 : vector<4xf32> to vector<1x4xf32>
    %cst_80 = arith.constant 8.000000e+00 : f32
    %140 = vector.broadcast %cst_80 : f32 to vector<1x4xf32>
    %141 = arith.divf %139, %140 : vector<1x4xf32>
    %142 = vector.shape_cast %141 : vector<1x4xf32> to vector<1x4xf32>
    %143 = vector.broadcast %142 : vector<1x4xf32> to vector<8x4xf32>
    %c2 = arith.constant 2 : index
    %c0_81 = arith.constant 0 : index
    %c0_82 = arith.constant 0 : index
    %144 = vector.load %arg10[%c2, %c0_81, %c0_82] : memref<8x8x4xf32, #tpu.memory_space<vmem>>, vector<1x8x4xf32>
    %145 = vector.shape_cast %144 : vector<1x8x4xf32> to vector<8x4xf32>
    %146 = vector.shape_cast %137 : vector<8x4xf32> to vector<1x8x4xf32>
    tpu.vector_store %arg10[%c2, %c0_81, %c0_82], %146 {strides = array<i32>} : memref<8x8x4xf32, #tpu.memory_space<vmem>>, vector<1x8x4xf32>,
    %c2_83 = arith.constant 2 : index
    %c0_84 = arith.constant 0 : index
    %c0_85 = arith.constant 0 : index
    %147 = vector.load %arg12[%c2_83, %c0_84, %c0_85] : memref<8x8x4xf32, #tpu.memory_space<vmem>>, vector<1x8x4xf32>
    %148 = vector.shape_cast %147 : vector<1x8x4xf32> to vector<8x4xf32>
    %149 = vector.shape_cast %143 : vector<8x4xf32> to vector<1x8x4xf32>
    tpu.vector_store %arg12[%c2_83, %c0_84, %c0_85], %149 {strides = array<i32>} : memref<8x8x4xf32, #tpu.memory_space<vmem>>, vector<1x8x4xf32>,
    %cst_86 = arith.constant 2.500000e-01 : f32
    %150 = vector.broadcast %cst_86 : f32 to vector<1x64xf32>
    %151 = arith.mulf %150, %2 : vector<1x64xf32>
    %152 = arith.addf %3, %151 : vector<1x64xf32>
    %cst_87 = arith.constant dense<0.000000e+00> : vector<8x64xf32>
    %153 = tpu.matmul %137, %0, %cst_87 {dimension_numbers = #tpu.dot_dimension_numbers<[1], [0], [0], [1], [0, 0, 1, 1], [], []>} : vector<8x4xf32>, vector<4x64xf32>, vector<8x64xf32> -> vector<8x64xf32>
    %cst_88 = arith.constant dense<0.000000e+00> : vector<1x64xf32>
    %154 = tpu.matmul %141, %1, %cst_88 {dimension_numbers = #tpu.dot_dimension_numbers<[1], [0], [0], [1], [0, 0, 1, 1], [], []>} : vector<1x4xf32>, vector<4x64xf32>, vector<1x64xf32> -> vector<1x64xf32>
    %155 = vector.broadcast %154 : vector<1x64xf32> to vector<8x64xf32>
    %156 = arith.addf %153, %155 : vector<8x64xf32>
    %157 = vector.broadcast %152 : vector<1x64xf32> to vector<8x64xf32>
    %158 = arith.addf %156, %157 : vector<8x64xf32>
    %cst_89 = arith.constant 0.000000e+00 : f32
    %159 = vector.broadcast %cst_89 : f32 to vector<8x64xf32>
    %160 = arith.maximumf %158, %159 : vector<8x64xf32>
    %cst_90 = arith.constant dense<0.000000e+00> : vector<8x32xf32>
    %161 = tpu.matmul %160, %4, %cst_90 {dimension_numbers = #tpu.dot_dimension_numbers<[1], [0], [0], [1], [0, 0, 1, 1], [], []>} : vector<8x64xf32>, vector<64x32xf32>, vector<8x32xf32> -> vector<8x32xf32>
    %162 = vector.broadcast %5 : vector<1x32xf32> to vector<8x32xf32>
    %163 = arith.addf %161, %162 : vector<8x32xf32>
    %cst_91 = arith.constant 0.000000e+00 : f32
    %164 = vector.broadcast %cst_91 : f32 to vector<8x32xf32>
    %165 = arith.maximumf %163, %164 : vector<8x32xf32>
    %cst_92 = arith.constant dense<0.000000e+00> : vector<8x4xf32>
    %166 = tpu.matmul %165, %6, %cst_92 {dimension_numbers = #tpu.dot_dimension_numbers<[1], [0], [0], [1], [0, 0, 1, 1], [], []>} : vector<8x32xf32>, vector<32x4xf32>, vector<8x4xf32> -> vector<8x4xf32>
    %167 = vector.broadcast %7 : vector<1x4xf32> to vector<8x4xf32>
    %168 = arith.addf %166, %167 : vector<8x4xf32>
    %c2_93 = arith.constant 2 : index
    %c0_94 = arith.constant 0 : index
    %c0_95 = arith.constant 0 : index
    %169 = vector.load %arg11[%c2_93, %c0_94, %c0_95] : memref<8x8x4xf32, #tpu.memory_space<vmem>>, vector<1x8x4xf32>
    %170 = vector.shape_cast %169 : vector<1x8x4xf32> to vector<8x4xf32>
    %171 = vector.shape_cast %168 : vector<8x4xf32> to vector<1x8x4xf32>
    tpu.vector_store %arg11[%c2_93, %c0_94, %c0_95], %171 {strides = array<i32>} : memref<8x8x4xf32, #tpu.memory_space<vmem>>, vector<1x8x4xf32>,
    %172 = arith.subf %137, %143 : vector<8x4xf32>
    %173 = arith.mulf %168, %168 : vector<8x4xf32>
    %cst_96 = arith.constant dense<0.000000e+00> : vector<8xf32>
    %174 = vector.multi_reduction <add>, %173, %cst_96 [1] : vector<8x4xf32> to vector<8xf32>
    %175 = vector.shape_cast %174 : vector<8xf32> to vector<8x1xf32>
    %cst_97 = arith.constant 5.000000e-01 : f32
    %176 = vector.broadcast %cst_97 : f32 to vector<8x1xf32>
    %177 = arith.mulf %176, %175 : vector<8x1xf32>
    %178 = arith.mulf %172, %172 : vector<8x4xf32>
    %cst_98 = arith.constant dense<0.000000e+00> : vector<8xf32>
    %179 = vector.multi_reduction <add>, %178, %cst_98 [1] : vector<8x4xf32> to vector<8xf32>
    %180 = vector.shape_cast %179 : vector<8xf32> to vector<8x1xf32>
    %cst_99 = arith.constant 5.000000e-01 : f32
    %181 = vector.broadcast %cst_99 : f32 to vector<8x1xf32>
    %182 = arith.mulf %181, %180 : vector<8x1xf32>
    %183 = arith.addf %177, %182 : vector<8x1xf32>
    %cst_100 = arith.constant 1.250000e-01 : f32
    %184 = vector.broadcast %cst_100 : f32 to vector<8x1xf32>
    %185 = arith.mulf %183, %184 : vector<8x1xf32>
    %186 = arith.addf %122, %185 : vector<8x1xf32>
    %187 = arith.subf %143, %137 : vector<8x4xf32>
    %188 = arith.addf %187, %168 : vector<8x4xf32>
    %cst_101 = arith.constant 1.250000e-01 : f32
    %189 = vector.broadcast %cst_101 : f32 to vector<8x4xf32>
    %190 = arith.mulf %188, %189 : vector<8x4xf32>
    %191 = arith.addf %137, %190 : vector<8x4xf32>
    %c2_102 = arith.constant 2 : index
    %c0_103 = arith.constant 0 : index
    %c0_104 = arith.constant 0 : index
    %192 = vector.load %arg8[%c2_102, %c0_103, %c0_104] : memref<8x8x4xf32, #tpu.memory_space<vmem>>, vector<1x8x4xf32>
    %193 = vector.shape_cast %192 : vector<1x8x4xf32> to vector<8x4xf32>
    %cst_105 = arith.constant 1.000000e-01 : f32
    %194 = vector.broadcast %cst_105 : f32 to vector<8x4xf32>
    %195 = arith.mulf %194, %193 : vector<8x4xf32>
    %196 = arith.addf %191, %195 : vector<8x4xf32>
    %c2_106 = arith.constant 2 : index
    %c0_107 = arith.constant 0 : index
    %c0_108 = arith.constant 0 : index
    %197 = vector.load %arg9[%c2_106, %c0_107, %c0_108] : memref<8x8x4xf32, #tpu.memory_space<vmem>>, vector<1x8x4xf32>
    %198 = vector.shape_cast %197 : vector<1x8x4xf32> to vector<8x4xf32>
    %cst_109 = arith.constant 5.000000e-02 : f32
    %199 = vector.broadcast %cst_109 : f32 to vector<8x4xf32>
    %200 = arith.mulf %199, %198 : vector<8x4xf32>
    %201 = arith.addf %196, %200 : vector<8x4xf32>
    %cst_110 = arith.constant dense<0.000000e+00> : vector<4xf32>
    %202 = vector.multi_reduction <add>, %201, %cst_110 [0] : vector<8x4xf32> to vector<4xf32>
    %203 = vector.shape_cast %202 : vector<4xf32> to vector<1x4xf32>
    %cst_111 = arith.constant 8.000000e+00 : f32
    %204 = vector.broadcast %cst_111 : f32 to vector<1x4xf32>
    %205 = arith.divf %203, %204 : vector<1x4xf32>
    %206 = vector.shape_cast %205 : vector<1x4xf32> to vector<1x4xf32>
    %207 = vector.broadcast %206 : vector<1x4xf32> to vector<8x4xf32>
    %c3 = arith.constant 3 : index
    %c0_112 = arith.constant 0 : index
    %c0_113 = arith.constant 0 : index
    %208 = vector.load %arg10[%c3, %c0_112, %c0_113] : memref<8x8x4xf32, #tpu.memory_space<vmem>>, vector<1x8x4xf32>
    %209 = vector.shape_cast %208 : vector<1x8x4xf32> to vector<8x4xf32>
    %210 = vector.shape_cast %201 : vector<8x4xf32> to vector<1x8x4xf32>
    tpu.vector_store %arg10[%c3, %c0_112, %c0_113], %210 {strides = array<i32>} : memref<8x8x4xf32, #tpu.memory_space<vmem>>, vector<1x8x4xf32>,
    %c3_114 = arith.constant 3 : index
    %c0_115 = arith.constant 0 : index
    %c0_116 = arith.constant 0 : index
    %211 = vector.load %arg12[%c3_114, %c0_115, %c0_116] : memref<8x8x4xf32, #tpu.memory_space<vmem>>, vector<1x8x4xf32>
    %212 = vector.shape_cast %211 : vector<1x8x4xf32> to vector<8x4xf32>
    %213 = vector.shape_cast %207 : vector<8x4xf32> to vector<1x8x4xf32>
    tpu.vector_store %arg12[%c3_114, %c0_115, %c0_116], %213 {strides = array<i32>} : memref<8x8x4xf32, #tpu.memory_space<vmem>>, vector<1x8x4xf32>,
    %cst_117 = arith.constant 3.750000e-01 : f32
    %214 = vector.broadcast %cst_117 : f32 to vector<1x64xf32>
    %215 = arith.mulf %214, %2 : vector<1x64xf32>
    %216 = arith.addf %3, %215 : vector<1x64xf32>
    %cst_118 = arith.constant dense<0.000000e+00> : vector<8x64xf32>
    %217 = tpu.matmul %201, %0, %cst_118 {dimension_numbers = #tpu.dot_dimension_numbers<[1], [0], [0], [1], [0, 0, 1, 1], [], []>} : vector<8x4xf32>, vector<4x64xf32>, vector<8x64xf32> -> vector<8x64xf32>
    %cst_119 = arith.constant dense<0.000000e+00> : vector<1x64xf32>
    %218 = tpu.matmul %205, %1, %cst_119 {dimension_numbers = #tpu.dot_dimension_numbers<[1], [0], [0], [1], [0, 0, 1, 1], [], []>} : vector<1x4xf32>, vector<4x64xf32>, vector<1x64xf32> -> vector<1x64xf32>
    %219 = vector.broadcast %218 : vector<1x64xf32> to vector<8x64xf32>
    %220 = arith.addf %217, %219 : vector<8x64xf32>
    %221 = vector.broadcast %216 : vector<1x64xf32> to vector<8x64xf32>
    %222 = arith.addf %220, %221 : vector<8x64xf32>
    %cst_120 = arith.constant 0.000000e+00 : f32
    %223 = vector.broadcast %cst_120 : f32 to vector<8x64xf32>
    %224 = arith.maximumf %222, %223 : vector<8x64xf32>
    %cst_121 = arith.constant dense<0.000000e+00> : vector<8x32xf32>
    %225 = tpu.matmul %224, %4, %cst_121 {dimension_numbers = #tpu.dot_dimension_numbers<[1], [0], [0], [1], [0, 0, 1, 1], [], []>} : vector<8x64xf32>, vector<64x32xf32>, vector<8x32xf32> -> vector<8x32xf32>
    %226 = vector.broadcast %5 : vector<1x32xf32> to vector<8x32xf32>
    %227 = arith.addf %225, %226 : vector<8x32xf32>
    %cst_122 = arith.constant 0.000000e+00 : f32
    %228 = vector.broadcast %cst_122 : f32 to vector<8x32xf32>
    %229 = arith.maximumf %227, %228 : vector<8x32xf32>
    %cst_123 = arith.constant dense<0.000000e+00> : vector<8x4xf32>
    %230 = tpu.matmul %229, %6, %cst_123 {dimension_numbers = #tpu.dot_dimension_numbers<[1], [0], [0], [1], [0, 0, 1, 1], [], []>} : vector<8x32xf32>, vector<32x4xf32>, vector<8x4xf32> -> vector<8x4xf32>
    %231 = vector.broadcast %7 : vector<1x4xf32> to vector<8x4xf32>
    %232 = arith.addf %230, %231 : vector<8x4xf32>
    %c3_124 = arith.constant 3 : index
    %c0_125 = arith.constant 0 : index
    %c0_126 = arith.constant 0 : index
    %233 = vector.load %arg11[%c3_124, %c0_125, %c0_126] : memref<8x8x4xf32, #tpu.memory_space<vmem>>, vector<1x8x4xf32>
    %234 = vector.shape_cast %233 : vector<1x8x4xf32> to vector<8x4xf32>
    %235 = vector.shape_cast %232 : vector<8x4xf32> to vector<1x8x4xf32>
    tpu.vector_store %arg11[%c3_124, %c0_125, %c0_126], %235 {strides = array<i32>} : memref<8x8x4xf32, #tpu.memory_space<vmem>>, vector<1x8x4xf32>,
    %236 = arith.subf %201, %207 : vector<8x4xf32>
    %237 = arith.mulf %232, %232 : vector<8x4xf32>
    %cst_127 = arith.constant dense<0.000000e+00> : vector<8xf32>
    %238 = vector.multi_reduction <add>, %237, %cst_127 [1] : vector<8x4xf32> to vector<8xf32>
    %239 = vector.shape_cast %238 : vector<8xf32> to vector<8x1xf32>
    %cst_128 = arith.constant 5.000000e-01 : f32
    %240 = vector.broadcast %cst_128 : f32 to vector<8x1xf32>
    %241 = arith.mulf %240, %239 : vector<8x1xf32>
    %242 = arith.mulf %236, %236 : vector<8x4xf32>
    %cst_129 = arith.constant dense<0.000000e+00> : vector<8xf32>
    %243 = vector.multi_reduction <add>, %242, %cst_129 [1] : vector<8x4xf32> to vector<8xf32>
    %244 = vector.shape_cast %243 : vector<8xf32> to vector<8x1xf32>
    %cst_130 = arith.constant 5.000000e-01 : f32
    %245 = vector.broadcast %cst_130 : f32 to vector<8x1xf32>
    %246 = arith.mulf %245, %244 : vector<8x1xf32>
    %247 = arith.addf %241, %246 : vector<8x1xf32>
    %cst_131 = arith.constant 1.250000e-01 : f32
    %248 = vector.broadcast %cst_131 : f32 to vector<8x1xf32>
    %249 = arith.mulf %247, %248 : vector<8x1xf32>
    %250 = arith.addf %186, %249 : vector<8x1xf32>
    %251 = arith.subf %207, %201 : vector<8x4xf32>
    %252 = arith.addf %251, %232 : vector<8x4xf32>
    %cst_132 = arith.constant 1.250000e-01 : f32
    %253 = vector.broadcast %cst_132 : f32 to vector<8x4xf32>
    %254 = arith.mulf %252, %253 : vector<8x4xf32>
    %255 = arith.addf %201, %254 : vector<8x4xf32>
    %c3_133 = arith.constant 3 : index
    %c0_134 = arith.constant 0 : index
    %c0_135 = arith.constant 0 : index
    %256 = vector.load %arg8[%c3_133, %c0_134, %c0_135] : memref<8x8x4xf32, #tpu.memory_space<vmem>>, vector<1x8x4xf32>
    %257 = vector.shape_cast %256 : vector<1x8x4xf32> to vector<8x4xf32>
    %cst_136 = arith.constant 1.000000e-01 : f32
    %258 = vector.broadcast %cst_136 : f32 to vector<8x4xf32>
    %259 = arith.mulf %258, %257 : vector<8x4xf32>
    %260 = arith.addf %255, %259 : vector<8x4xf32>
    %c3_137 = arith.constant 3 : index
    %c0_138 = arith.constant 0 : index
    %c0_139 = arith.constant 0 : index
    %261 = vector.load %arg9[%c3_137, %c0_138, %c0_139] : memref<8x8x4xf32, #tpu.memory_space<vmem>>, vector<1x8x4xf32>
    %262 = vector.shape_cast %261 : vector<1x8x4xf32> to vector<8x4xf32>
    %cst_140 = arith.constant 5.000000e-02 : f32
    %263 = vector.broadcast %cst_140 : f32 to vector<8x4xf32>
    %264 = arith.mulf %263, %262 : vector<8x4xf32>
    %265 = arith.addf %260, %264 : vector<8x4xf32>
    %cst_141 = arith.constant dense<0.000000e+00> : vector<4xf32>
    %266 = vector.multi_reduction <add>, %265, %cst_141 [0] : vector<8x4xf32> to vector<4xf32>
    %267 = vector.shape_cast %266 : vector<4xf32> to vector<1x4xf32>
    %cst_142 = arith.constant 8.000000e+00 : f32
    %268 = vector.broadcast %cst_142 : f32 to vector<1x4xf32>
    %269 = arith.divf %267, %268 : vector<1x4xf32>
    %270 = vector.shape_cast %269 : vector<1x4xf32> to vector<1x4xf32>
    %271 = vector.broadcast %270 : vector<1x4xf32> to vector<8x4xf32>
    %c4 = arith.constant 4 : index
    %c0_143 = arith.constant 0 : index
    %c0_144 = arith.constant 0 : index
    %272 = vector.load %arg10[%c4, %c0_143, %c0_144] : memref<8x8x4xf32, #tpu.memory_space<vmem>>, vector<1x8x4xf32>
    %273 = vector.shape_cast %272 : vector<1x8x4xf32> to vector<8x4xf32>
    %274 = vector.shape_cast %265 : vector<8x4xf32> to vector<1x8x4xf32>
    tpu.vector_store %arg10[%c4, %c0_143, %c0_144], %274 {strides = array<i32>} : memref<8x8x4xf32, #tpu.memory_space<vmem>>, vector<1x8x4xf32>,
    %c4_145 = arith.constant 4 : index
    %c0_146 = arith.constant 0 : index
    %c0_147 = arith.constant 0 : index
    %275 = vector.load %arg12[%c4_145, %c0_146, %c0_147] : memref<8x8x4xf32, #tpu.memory_space<vmem>>, vector<1x8x4xf32>
    %276 = vector.shape_cast %275 : vector<1x8x4xf32> to vector<8x4xf32>
    %277 = vector.shape_cast %271 : vector<8x4xf32> to vector<1x8x4xf32>
    tpu.vector_store %arg12[%c4_145, %c0_146, %c0_147], %277 {strides = array<i32>} : memref<8x8x4xf32, #tpu.memory_space<vmem>>, vector<1x8x4xf32>,
    %cst_148 = arith.constant 5.000000e-01 : f32
    %278 = vector.broadcast %cst_148 : f32 to vector<1x64xf32>
    %279 = arith.mulf %278, %2 : vector<1x64xf32>
    %280 = arith.addf %3, %279 : vector<1x64xf32>
    %cst_149 = arith.constant dense<0.000000e+00> : vector<8x64xf32>
    %281 = tpu.matmul %265, %0, %cst_149 {dimension_numbers = #tpu.dot_dimension_numbers<[1], [0], [0], [1], [0, 0, 1, 1], [], []>} : vector<8x4xf32>, vector<4x64xf32>, vector<8x64xf32> -> vector<8x64xf32>
    %cst_150 = arith.constant dense<0.000000e+00> : vector<1x64xf32>
    %282 = tpu.matmul %269, %1, %cst_150 {dimension_numbers = #tpu.dot_dimension_numbers<[1], [0], [0], [1], [0, 0, 1, 1], [], []>} : vector<1x4xf32>, vector<4x64xf32>, vector<1x64xf32> -> vector<1x64xf32>
    %283 = vector.broadcast %282 : vector<1x64xf32> to vector<8x64xf32>
    %284 = arith.addf %281, %283 : vector<8x64xf32>
    %285 = vector.broadcast %280 : vector<1x64xf32> to vector<8x64xf32>
    %286 = arith.addf %284, %285 : vector<8x64xf32>
    %cst_151 = arith.constant 0.000000e+00 : f32
    %287 = vector.broadcast %cst_151 : f32 to vector<8x64xf32>
    %288 = arith.maximumf %286, %287 : vector<8x64xf32>
    %cst_152 = arith.constant dense<0.000000e+00> : vector<8x32xf32>
    %289 = tpu.matmul %288, %4, %cst_152 {dimension_numbers = #tpu.dot_dimension_numbers<[1], [0], [0], [1], [0, 0, 1, 1], [], []>} : vector<8x64xf32>, vector<64x32xf32>, vector<8x32xf32> -> vector<8x32xf32>
    %290 = vector.broadcast %5 : vector<1x32xf32> to vector<8x32xf32>
    %291 = arith.addf %289, %290 : vector<8x32xf32>
    %cst_153 = arith.constant 0.000000e+00 : f32
    %292 = vector.broadcast %cst_153 : f32 to vector<8x32xf32>
    %293 = arith.maximumf %291, %292 : vector<8x32xf32>
    %cst_154 = arith.constant dense<0.000000e+00> : vector<8x4xf32>
    %294 = tpu.matmul %293, %6, %cst_154 {dimension_numbers = #tpu.dot_dimension_numbers<[1], [0], [0], [1], [0, 0, 1, 1], [], []>} : vector<8x32xf32>, vector<32x4xf32>, vector<8x4xf32> -> vector<8x4xf32>
    %295 = vector.broadcast %7 : vector<1x4xf32> to vector<8x4xf32>
    %296 = arith.addf %294, %295 : vector<8x4xf32>
    %c4_155 = arith.constant 4 : index
    %c0_156 = arith.constant 0 : index
    %c0_157 = arith.constant 0 : index
    %297 = vector.load %arg11[%c4_155, %c0_156, %c0_157] : memref<8x8x4xf32, #tpu.memory_space<vmem>>, vector<1x8x4xf32>
    %298 = vector.shape_cast %297 : vector<1x8x4xf32> to vector<8x4xf32>
    %299 = vector.shape_cast %296 : vector<8x4xf32> to vector<1x8x4xf32>
    tpu.vector_store %arg11[%c4_155, %c0_156, %c0_157], %299 {strides = array<i32>} : memref<8x8x4xf32, #tpu.memory_space<vmem>>, vector<1x8x4xf32>,
    %300 = arith.subf %265, %271 : vector<8x4xf32>
    %301 = arith.mulf %296, %296 : vector<8x4xf32>
    %cst_158 = arith.constant dense<0.000000e+00> : vector<8xf32>
    %302 = vector.multi_reduction <add>, %301, %cst_158 [1] : vector<8x4xf32> to vector<8xf32>
    %303 = vector.shape_cast %302 : vector<8xf32> to vector<8x1xf32>
    %cst_159 = arith.constant 5.000000e-01 : f32
    %304 = vector.broadcast %cst_159 : f32 to vector<8x1xf32>
    %305 = arith.mulf %304, %303 : vector<8x1xf32>
    %306 = arith.mulf %300, %300 : vector<8x4xf32>
    %cst_160 = arith.constant dense<0.000000e+00> : vector<8xf32>
    %307 = vector.multi_reduction <add>, %306, %cst_160 [1] : vector<8x4xf32> to vector<8xf32>
    %308 = vector.shape_cast %307 : vector<8xf32> to vector<8x1xf32>
    %cst_161 = arith.constant 5.000000e-01 : f32
    %309 = vector.broadcast %cst_161 : f32 to vector<8x1xf32>
    %310 = arith.mulf %309, %308 : vector<8x1xf32>
    %311 = arith.addf %305, %310 : vector<8x1xf32>
    %cst_162 = arith.constant 1.250000e-01 : f32
    %312 = vector.broadcast %cst_162 : f32 to vector<8x1xf32>
    %313 = arith.mulf %311, %312 : vector<8x1xf32>
    %314 = arith.addf %250, %313 : vector<8x1xf32>
    %315 = arith.subf %271, %265 : vector<8x4xf32>
    %316 = arith.addf %315, %296 : vector<8x4xf32>
    %cst_163 = arith.constant 1.250000e-01 : f32
    %317 = vector.broadcast %cst_163 : f32 to vector<8x4xf32>
    %318 = arith.mulf %316, %317 : vector<8x4xf32>
    %319 = arith.addf %265, %318 : vector<8x4xf32>
    %c4_164 = arith.constant 4 : index
    %c0_165 = arith.constant 0 : index
    %c0_166 = arith.constant 0 : index
    %320 = vector.load %arg8[%c4_164, %c0_165, %c0_166] : memref<8x8x4xf32, #tpu.memory_space<vmem>>, vector<1x8x4xf32>
    %321 = vector.shape_cast %320 : vector<1x8x4xf32> to vector<8x4xf32>
    %cst_167 = arith.constant 1.000000e-01 : f32
    %322 = vector.broadcast %cst_167 : f32 to vector<8x4xf32>
    %323 = arith.mulf %322, %321 : vector<8x4xf32>
    %324 = arith.addf %319, %323 : vector<8x4xf32>
    %c4_168 = arith.constant 4 : index
    %c0_169 = arith.constant 0 : index
    %c0_170 = arith.constant 0 : index
    %325 = vector.load %arg9[%c4_168, %c0_169, %c0_170] : memref<8x8x4xf32, #tpu.memory_space<vmem>>, vector<1x8x4xf32>
    %326 = vector.shape_cast %325 : vector<1x8x4xf32> to vector<8x4xf32>
    %cst_171 = arith.constant 5.000000e-02 : f32
    %327 = vector.broadcast %cst_171 : f32 to vector<8x4xf32>
    %328 = arith.mulf %327, %326 : vector<8x4xf32>
    %329 = arith.addf %324, %328 : vector<8x4xf32>
    %cst_172 = arith.constant dense<0.000000e+00> : vector<4xf32>
    %330 = vector.multi_reduction <add>, %329, %cst_172 [0] : vector<8x4xf32> to vector<4xf32>
    %331 = vector.shape_cast %330 : vector<4xf32> to vector<1x4xf32>
    %cst_173 = arith.constant 8.000000e+00 : f32
    %332 = vector.broadcast %cst_173 : f32 to vector<1x4xf32>
    %333 = arith.divf %331, %332 : vector<1x4xf32>
    %334 = vector.shape_cast %333 : vector<1x4xf32> to vector<1x4xf32>
    %335 = vector.broadcast %334 : vector<1x4xf32> to vector<8x4xf32>
    %c5 = arith.constant 5 : index
    %c0_174 = arith.constant 0 : index
    %c0_175 = arith.constant 0 : index
    %336 = vector.load %arg10[%c5, %c0_174, %c0_175] : memref<8x8x4xf32, #tpu.memory_space<vmem>>, vector<1x8x4xf32>
    %337 = vector.shape_cast %336 : vector<1x8x4xf32> to vector<8x4xf32>
    %338 = vector.shape_cast %329 : vector<8x4xf32> to vector<1x8x4xf32>
    tpu.vector_store %arg10[%c5, %c0_174, %c0_175], %338 {strides = array<i32>} : memref<8x8x4xf32, #tpu.memory_space<vmem>>, vector<1x8x4xf32>,
    %c5_176 = arith.constant 5 : index
    %c0_177 = arith.constant 0 : index
    %c0_178 = arith.constant 0 : index
    %339 = vector.load %arg12[%c5_176, %c0_177, %c0_178] : memref<8x8x4xf32, #tpu.memory_space<vmem>>, vector<1x8x4xf32>
    %340 = vector.shape_cast %339 : vector<1x8x4xf32> to vector<8x4xf32>
    %341 = vector.shape_cast %335 : vector<8x4xf32> to vector<1x8x4xf32>
    tpu.vector_store %arg12[%c5_176, %c0_177, %c0_178], %341 {strides = array<i32>} : memref<8x8x4xf32, #tpu.memory_space<vmem>>, vector<1x8x4xf32>,
    %cst_179 = arith.constant 6.250000e-01 : f32
    %342 = vector.broadcast %cst_179 : f32 to vector<1x64xf32>
    %343 = arith.mulf %342, %2 : vector<1x64xf32>
    %344 = arith.addf %3, %343 : vector<1x64xf32>
    %cst_180 = arith.constant dense<0.000000e+00> : vector<8x64xf32>
    %345 = tpu.matmul %329, %0, %cst_180 {dimension_numbers = #tpu.dot_dimension_numbers<[1], [0], [0], [1], [0, 0, 1, 1], [], []>} : vector<8x4xf32>, vector<4x64xf32>, vector<8x64xf32> -> vector<8x64xf32>
    %cst_181 = arith.constant dense<0.000000e+00> : vector<1x64xf32>
    %346 = tpu.matmul %333, %1, %cst_181 {dimension_numbers = #tpu.dot_dimension_numbers<[1], [0], [0], [1], [0, 0, 1, 1], [], []>} : vector<1x4xf32>, vector<4x64xf32>, vector<1x64xf32> -> vector<1x64xf32>
    %347 = vector.broadcast %346 : vector<1x64xf32> to vector<8x64xf32>
    %348 = arith.addf %345, %347 : vector<8x64xf32>
    %349 = vector.broadcast %344 : vector<1x64xf32> to vector<8x64xf32>
    %350 = arith.addf %348, %349 : vector<8x64xf32>
    %cst_182 = arith.constant 0.000000e+00 : f32
    %351 = vector.broadcast %cst_182 : f32 to vector<8x64xf32>
    %352 = arith.maximumf %350, %351 : vector<8x64xf32>
    %cst_183 = arith.constant dense<0.000000e+00> : vector<8x32xf32>
    %353 = tpu.matmul %352, %4, %cst_183 {dimension_numbers = #tpu.dot_dimension_numbers<[1], [0], [0], [1], [0, 0, 1, 1], [], []>} : vector<8x64xf32>, vector<64x32xf32>, vector<8x32xf32> -> vector<8x32xf32>
    %354 = vector.broadcast %5 : vector<1x32xf32> to vector<8x32xf32>
    %355 = arith.addf %353, %354 : vector<8x32xf32>
    %cst_184 = arith.constant 0.000000e+00 : f32
    %356 = vector.broadcast %cst_184 : f32 to vector<8x32xf32>
    %357 = arith.maximumf %355, %356 : vector<8x32xf32>
    %cst_185 = arith.constant dense<0.000000e+00> : vector<8x4xf32>
    %358 = tpu.matmul %357, %6, %cst_185 {dimension_numbers = #tpu.dot_dimension_numbers<[1], [0], [0], [1], [0, 0, 1, 1], [], []>} : vector<8x32xf32>, vector<32x4xf32>, vector<8x4xf32> -> vector<8x4xf32>
    %359 = vector.broadcast %7 : vector<1x4xf32> to vector<8x4xf32>
    %360 = arith.addf %358, %359 : vector<8x4xf32>
    %c5_186 = arith.constant 5 : index
    %c0_187 = arith.constant 0 : index
    %c0_188 = arith.constant 0 : index
    %361 = vector.load %arg11[%c5_186, %c0_187, %c0_188] : memref<8x8x4xf32, #tpu.memory_space<vmem>>, vector<1x8x4xf32>
    %362 = vector.shape_cast %361 : vector<1x8x4xf32> to vector<8x4xf32>
    %363 = vector.shape_cast %360 : vector<8x4xf32> to vector<1x8x4xf32>
    tpu.vector_store %arg11[%c5_186, %c0_187, %c0_188], %363 {strides = array<i32>} : memref<8x8x4xf32, #tpu.memory_space<vmem>>, vector<1x8x4xf32>,
    %364 = arith.subf %329, %335 : vector<8x4xf32>
    %365 = arith.mulf %360, %360 : vector<8x4xf32>
    %cst_189 = arith.constant dense<0.000000e+00> : vector<8xf32>
    %366 = vector.multi_reduction <add>, %365, %cst_189 [1] : vector<8x4xf32> to vector<8xf32>
    %367 = vector.shape_cast %366 : vector<8xf32> to vector<8x1xf32>
    %cst_190 = arith.constant 5.000000e-01 : f32
    %368 = vector.broadcast %cst_190 : f32 to vector<8x1xf32>
    %369 = arith.mulf %368, %367 : vector<8x1xf32>
    %370 = arith.mulf %364, %364 : vector<8x4xf32>
    %cst_191 = arith.constant dense<0.000000e+00> : vector<8xf32>
    %371 = vector.multi_reduction <add>, %370, %cst_191 [1] : vector<8x4xf32> to vector<8xf32>
    %372 = vector.shape_cast %371 : vector<8xf32> to vector<8x1xf32>
    %cst_192 = arith.constant 5.000000e-01 : f32
    %373 = vector.broadcast %cst_192 : f32 to vector<8x1xf32>
    %374 = arith.mulf %373, %372 : vector<8x1xf32>
    %375 = arith.addf %369, %374 : vector<8x1xf32>
    %cst_193 = arith.constant 1.250000e-01 : f32
    %376 = vector.broadcast %cst_193 : f32 to vector<8x1xf32>
    %377 = arith.mulf %375, %376 : vector<8x1xf32>
    %378 = arith.addf %314, %377 : vector<8x1xf32>
    %379 = arith.subf %335, %329 : vector<8x4xf32>
    %380 = arith.addf %379, %360 : vector<8x4xf32>
    %cst_194 = arith.constant 1.250000e-01 : f32
    %381 = vector.broadcast %cst_194 : f32 to vector<8x4xf32>
    %382 = arith.mulf %380, %381 : vector<8x4xf32>
    %383 = arith.addf %329, %382 : vector<8x4xf32>
    %c5_195 = arith.constant 5 : index
    %c0_196 = arith.constant 0 : index
    %c0_197 = arith.constant 0 : index
    %384 = vector.load %arg8[%c5_195, %c0_196, %c0_197] : memref<8x8x4xf32, #tpu.memory_space<vmem>>, vector<1x8x4xf32>
    %385 = vector.shape_cast %384 : vector<1x8x4xf32> to vector<8x4xf32>
    %cst_198 = arith.constant 1.000000e-01 : f32
    %386 = vector.broadcast %cst_198 : f32 to vector<8x4xf32>
    %387 = arith.mulf %386, %385 : vector<8x4xf32>
    %388 = arith.addf %383, %387 : vector<8x4xf32>
    %c5_199 = arith.constant 5 : index
    %c0_200 = arith.constant 0 : index
    %c0_201 = arith.constant 0 : index
    %389 = vector.load %arg9[%c5_199, %c0_200, %c0_201] : memref<8x8x4xf32, #tpu.memory_space<vmem>>, vector<1x8x4xf32>
    %390 = vector.shape_cast %389 : vector<1x8x4xf32> to vector<8x4xf32>
    %cst_202 = arith.constant 5.000000e-02 : f32
    %391 = vector.broadcast %cst_202 : f32 to vector<8x4xf32>
    %392 = arith.mulf %391, %390 : vector<8x4xf32>
    %393 = arith.addf %388, %392 : vector<8x4xf32>
    %cst_203 = arith.constant dense<0.000000e+00> : vector<4xf32>
    %394 = vector.multi_reduction <add>, %393, %cst_203 [0] : vector<8x4xf32> to vector<4xf32>
    %395 = vector.shape_cast %394 : vector<4xf32> to vector<1x4xf32>
    %cst_204 = arith.constant 8.000000e+00 : f32
    %396 = vector.broadcast %cst_204 : f32 to vector<1x4xf32>
    %397 = arith.divf %395, %396 : vector<1x4xf32>
    %398 = vector.shape_cast %397 : vector<1x4xf32> to vector<1x4xf32>
    %399 = vector.broadcast %398 : vector<1x4xf32> to vector<8x4xf32>
    %c6 = arith.constant 6 : index
    %c0_205 = arith.constant 0 : index
    %c0_206 = arith.constant 0 : index
    %400 = vector.load %arg10[%c6, %c0_205, %c0_206] : memref<8x8x4xf32, #tpu.memory_space<vmem>>, vector<1x8x4xf32>
    %401 = vector.shape_cast %400 : vector<1x8x4xf32> to vector<8x4xf32>
    %402 = vector.shape_cast %393 : vector<8x4xf32> to vector<1x8x4xf32>
    tpu.vector_store %arg10[%c6, %c0_205, %c0_206], %402 {strides = array<i32>} : memref<8x8x4xf32, #tpu.memory_space<vmem>>, vector<1x8x4xf32>,
    %c6_207 = arith.constant 6 : index
    %c0_208 = arith.constant 0 : index
    %c0_209 = arith.constant 0 : index
    %403 = vector.load %arg12[%c6_207, %c0_208, %c0_209] : memref<8x8x4xf32, #tpu.memory_space<vmem>>, vector<1x8x4xf32>
    %404 = vector.shape_cast %403 : vector<1x8x4xf32> to vector<8x4xf32>
    %405 = vector.shape_cast %399 : vector<8x4xf32> to vector<1x8x4xf32>
    tpu.vector_store %arg12[%c6_207, %c0_208, %c0_209], %405 {strides = array<i32>} : memref<8x8x4xf32, #tpu.memory_space<vmem>>, vector<1x8x4xf32>,
    %cst_210 = arith.constant 7.500000e-01 : f32
    %406 = vector.broadcast %cst_210 : f32 to vector<1x64xf32>
    %407 = arith.mulf %406, %2 : vector<1x64xf32>
    %408 = arith.addf %3, %407 : vector<1x64xf32>
    %cst_211 = arith.constant dense<0.000000e+00> : vector<8x64xf32>
    %409 = tpu.matmul %393, %0, %cst_211 {dimension_numbers = #tpu.dot_dimension_numbers<[1], [0], [0], [1], [0, 0, 1, 1], [], []>} : vector<8x4xf32>, vector<4x64xf32>, vector<8x64xf32> -> vector<8x64xf32>
    %cst_212 = arith.constant dense<0.000000e+00> : vector<1x64xf32>
    %410 = tpu.matmul %397, %1, %cst_212 {dimension_numbers = #tpu.dot_dimension_numbers<[1], [0], [0], [1], [0, 0, 1, 1], [], []>} : vector<1x4xf32>, vector<4x64xf32>, vector<1x64xf32> -> vector<1x64xf32>
    %411 = vector.broadcast %410 : vector<1x64xf32> to vector<8x64xf32>
    %412 = arith.addf %409, %411 : vector<8x64xf32>
    %413 = vector.broadcast %408 : vector<1x64xf32> to vector<8x64xf32>
    %414 = arith.addf %412, %413 : vector<8x64xf32>
    %cst_213 = arith.constant 0.000000e+00 : f32
    %415 = vector.broadcast %cst_213 : f32 to vector<8x64xf32>
    %416 = arith.maximumf %414, %415 : vector<8x64xf32>
    %cst_214 = arith.constant dense<0.000000e+00> : vector<8x32xf32>
    %417 = tpu.matmul %416, %4, %cst_214 {dimension_numbers = #tpu.dot_dimension_numbers<[1], [0], [0], [1], [0, 0, 1, 1], [], []>} : vector<8x64xf32>, vector<64x32xf32>, vector<8x32xf32> -> vector<8x32xf32>
    %418 = vector.broadcast %5 : vector<1x32xf32> to vector<8x32xf32>
    %419 = arith.addf %417, %418 : vector<8x32xf32>
    %cst_215 = arith.constant 0.000000e+00 : f32
    %420 = vector.broadcast %cst_215 : f32 to vector<8x32xf32>
    %421 = arith.maximumf %419, %420 : vector<8x32xf32>
    %cst_216 = arith.constant dense<0.000000e+00> : vector<8x4xf32>
    %422 = tpu.matmul %421, %6, %cst_216 {dimension_numbers = #tpu.dot_dimension_numbers<[1], [0], [0], [1], [0, 0, 1, 1], [], []>} : vector<8x32xf32>, vector<32x4xf32>, vector<8x4xf32> -> vector<8x4xf32>
    %423 = vector.broadcast %7 : vector<1x4xf32> to vector<8x4xf32>
    %424 = arith.addf %422, %423 : vector<8x4xf32>
    %c6_217 = arith.constant 6 : index
    %c0_218 = arith.constant 0 : index
    %c0_219 = arith.constant 0 : index
    %425 = vector.load %arg11[%c6_217, %c0_218, %c0_219] : memref<8x8x4xf32, #tpu.memory_space<vmem>>, vector<1x8x4xf32>
    %426 = vector.shape_cast %425 : vector<1x8x4xf32> to vector<8x4xf32>
    %427 = vector.shape_cast %424 : vector<8x4xf32> to vector<1x8x4xf32>
    tpu.vector_store %arg11[%c6_217, %c0_218, %c0_219], %427 {strides = array<i32>} : memref<8x8x4xf32, #tpu.memory_space<vmem>>, vector<1x8x4xf32>,
    %428 = arith.subf %393, %399 : vector<8x4xf32>
    %429 = arith.mulf %424, %424 : vector<8x4xf32>
    %cst_220 = arith.constant dense<0.000000e+00> : vector<8xf32>
    %430 = vector.multi_reduction <add>, %429, %cst_220 [1] : vector<8x4xf32> to vector<8xf32>
    %431 = vector.shape_cast %430 : vector<8xf32> to vector<8x1xf32>
    %cst_221 = arith.constant 5.000000e-01 : f32
    %432 = vector.broadcast %cst_221 : f32 to vector<8x1xf32>
    %433 = arith.mulf %432, %431 : vector<8x1xf32>
    %434 = arith.mulf %428, %428 : vector<8x4xf32>
    %cst_222 = arith.constant dense<0.000000e+00> : vector<8xf32>
    %435 = vector.multi_reduction <add>, %434, %cst_222 [1] : vector<8x4xf32> to vector<8xf32>
    %436 = vector.shape_cast %435 : vector<8xf32> to vector<8x1xf32>
    %cst_223 = arith.constant 5.000000e-01 : f32
    %437 = vector.broadcast %cst_223 : f32 to vector<8x1xf32>
    %438 = arith.mulf %437, %436 : vector<8x1xf32>
    %439 = arith.addf %433, %438 : vector<8x1xf32>
    %cst_224 = arith.constant 1.250000e-01 : f32
    %440 = vector.broadcast %cst_224 : f32 to vector<8x1xf32>
    %441 = arith.mulf %439, %440 : vector<8x1xf32>
    %442 = arith.addf %378, %441 : vector<8x1xf32>
    %443 = arith.subf %399, %393 : vector<8x4xf32>
    %444 = arith.addf %443, %424 : vector<8x4xf32>
    %cst_225 = arith.constant 1.250000e-01 : f32
    %445 = vector.broadcast %cst_225 : f32 to vector<8x4xf32>
    %446 = arith.mulf %444, %445 : vector<8x4xf32>
    %447 = arith.addf %393, %446 : vector<8x4xf32>
    %c6_226 = arith.constant 6 : index
    %c0_227 = arith.constant 0 : index
    %c0_228 = arith.constant 0 : index
    %448 = vector.load %arg8[%c6_226, %c0_227, %c0_228] : memref<8x8x4xf32, #tpu.memory_space<vmem>>, vector<1x8x4xf32>
    %449 = vector.shape_cast %448 : vector<1x8x4xf32> to vector<8x4xf32>
    %cst_229 = arith.constant 1.000000e-01 : f32
    %450 = vector.broadcast %cst_229 : f32 to vector<8x4xf32>
    %451 = arith.mulf %450, %449 : vector<8x4xf32>
    %452 = arith.addf %447, %451 : vector<8x4xf32>
    %c6_230 = arith.constant 6 : index
    %c0_231 = arith.constant 0 : index
    %c0_232 = arith.constant 0 : index
    %453 = vector.load %arg9[%c6_230, %c0_231, %c0_232] : memref<8x8x4xf32, #tpu.memory_space<vmem>>, vector<1x8x4xf32>
    %454 = vector.shape_cast %453 : vector<1x8x4xf32> to vector<8x4xf32>
    %cst_233 = arith.constant 5.000000e-02 : f32
    %455 = vector.broadcast %cst_233 : f32 to vector<8x4xf32>
    %456 = arith.mulf %455, %454 : vector<8x4xf32>
    %457 = arith.addf %452, %456 : vector<8x4xf32>
    %cst_234 = arith.constant dense<0.000000e+00> : vector<4xf32>
    %458 = vector.multi_reduction <add>, %457, %cst_234 [0] : vector<8x4xf32> to vector<4xf32>
    %459 = vector.shape_cast %458 : vector<4xf32> to vector<1x4xf32>
    %cst_235 = arith.constant 8.000000e+00 : f32
    %460 = vector.broadcast %cst_235 : f32 to vector<1x4xf32>
    %461 = arith.divf %459, %460 : vector<1x4xf32>
    %462 = vector.shape_cast %461 : vector<1x4xf32> to vector<1x4xf32>
    %463 = vector.broadcast %462 : vector<1x4xf32> to vector<8x4xf32>
    %c7 = arith.constant 7 : index
    %c0_236 = arith.constant 0 : index
    %c0_237 = arith.constant 0 : index
    %464 = vector.load %arg10[%c7, %c0_236, %c0_237] : memref<8x8x4xf32, #tpu.memory_space<vmem>>, vector<1x8x4xf32>
    %465 = vector.shape_cast %464 : vector<1x8x4xf32> to vector<8x4xf32>
    %466 = vector.shape_cast %457 : vector<8x4xf32> to vector<1x8x4xf32>
    tpu.vector_store %arg10[%c7, %c0_236, %c0_237], %466 {strides = array<i32>} : memref<8x8x4xf32, #tpu.memory_space<vmem>>, vector<1x8x4xf32>,
    %c7_238 = arith.constant 7 : index
    %c0_239 = arith.constant 0 : index
    %c0_240 = arith.constant 0 : index
    %467 = vector.load %arg12[%c7_238, %c0_239, %c0_240] : memref<8x8x4xf32, #tpu.memory_space<vmem>>, vector<1x8x4xf32>
    %468 = vector.shape_cast %467 : vector<1x8x4xf32> to vector<8x4xf32>
    %469 = vector.shape_cast %463 : vector<8x4xf32> to vector<1x8x4xf32>
    tpu.vector_store %arg12[%c7_238, %c0_239, %c0_240], %469 {strides = array<i32>} : memref<8x8x4xf32, #tpu.memory_space<vmem>>, vector<1x8x4xf32>,
    %cst_241 = arith.constant 8.750000e-01 : f32
    %470 = vector.broadcast %cst_241 : f32 to vector<1x64xf32>
    %471 = arith.mulf %470, %2 : vector<1x64xf32>
    %472 = arith.addf %3, %471 : vector<1x64xf32>
    %cst_242 = arith.constant dense<0.000000e+00> : vector<8x64xf32>
    %473 = tpu.matmul %457, %0, %cst_242 {dimension_numbers = #tpu.dot_dimension_numbers<[1], [0], [0], [1], [0, 0, 1, 1], [], []>} : vector<8x4xf32>, vector<4x64xf32>, vector<8x64xf32> -> vector<8x64xf32>
    %cst_243 = arith.constant dense<0.000000e+00> : vector<1x64xf32>
    %474 = tpu.matmul %461, %1, %cst_243 {dimension_numbers = #tpu.dot_dimension_numbers<[1], [0], [0], [1], [0, 0, 1, 1], [], []>} : vector<1x4xf32>, vector<4x64xf32>, vector<1x64xf32> -> vector<1x64xf32>
    %475 = vector.broadcast %474 : vector<1x64xf32> to vector<8x64xf32>
    %476 = arith.addf %473, %475 : vector<8x64xf32>
    %477 = vector.broadcast %472 : vector<1x64xf32> to vector<8x64xf32>
    %478 = arith.addf %476, %477 : vector<8x64xf32>
    %cst_244 = arith.constant 0.000000e+00 : f32
    %479 = vector.broadcast %cst_244 : f32 to vector<8x64xf32>
    %480 = arith.maximumf %478, %479 : vector<8x64xf32>
    %cst_245 = arith.constant dense<0.000000e+00> : vector<8x32xf32>
    %481 = tpu.matmul %480, %4, %cst_245 {dimension_numbers = #tpu.dot_dimension_numbers<[1], [0], [0], [1], [0, 0, 1, 1], [], []>} : vector<8x64xf32>, vector<64x32xf32>, vector<8x32xf32> -> vector<8x32xf32>
    %482 = vector.broadcast %5 : vector<1x32xf32> to vector<8x32xf32>
    %483 = arith.addf %481, %482 : vector<8x32xf32>
    %cst_246 = arith.constant 0.000000e+00 : f32
    %484 = vector.broadcast %cst_246 : f32 to vector<8x32xf32>
    %485 = arith.maximumf %483, %484 : vector<8x32xf32>
    %cst_247 = arith.constant dense<0.000000e+00> : vector<8x4xf32>
    %486 = tpu.matmul %485, %6, %cst_247 {dimension_numbers = #tpu.dot_dimension_numbers<[1], [0], [0], [1], [0, 0, 1, 1], [], []>} : vector<8x32xf32>, vector<32x4xf32>, vector<8x4xf32> -> vector<8x4xf32>
    %487 = vector.broadcast %7 : vector<1x4xf32> to vector<8x4xf32>
    %488 = arith.addf %486, %487 : vector<8x4xf32>
    %c7_248 = arith.constant 7 : index
    %c0_249 = arith.constant 0 : index
    %c0_250 = arith.constant 0 : index
    %489 = vector.load %arg11[%c7_248, %c0_249, %c0_250] : memref<8x8x4xf32, #tpu.memory_space<vmem>>, vector<1x8x4xf32>
    %490 = vector.shape_cast %489 : vector<1x8x4xf32> to vector<8x4xf32>
    %491 = vector.shape_cast %488 : vector<8x4xf32> to vector<1x8x4xf32>
    tpu.vector_store %arg11[%c7_248, %c0_249, %c0_250], %491 {strides = array<i32>} : memref<8x8x4xf32, #tpu.memory_space<vmem>>, vector<1x8x4xf32>,
    %492 = arith.subf %457, %463 : vector<8x4xf32>
    %493 = arith.mulf %488, %488 : vector<8x4xf32>
    %cst_251 = arith.constant dense<0.000000e+00> : vector<8xf32>
    %494 = vector.multi_reduction <add>, %493, %cst_251 [1] : vector<8x4xf32> to vector<8xf32>
    %495 = vector.shape_cast %494 : vector<8xf32> to vector<8x1xf32>
    %cst_252 = arith.constant 5.000000e-01 : f32
    %496 = vector.broadcast %cst_252 : f32 to vector<8x1xf32>
    %497 = arith.mulf %496, %495 : vector<8x1xf32>
    %498 = arith.mulf %492, %492 : vector<8x4xf32>
    %cst_253 = arith.constant dense<0.000000e+00> : vector<8xf32>
    %499 = vector.multi_reduction <add>, %498, %cst_253 [1] : vector<8x4xf32> to vector<8xf32>
    %500 = vector.shape_cast %499 : vector<8xf32> to vector<8x1xf32>
    %cst_254 = arith.constant 5.000000e-01 : f32
    %501 = vector.broadcast %cst_254 : f32 to vector<8x1xf32>
    %502 = arith.mulf %501, %500 : vector<8x1xf32>
    %503 = arith.addf %497, %502 : vector<8x1xf32>
    %cst_255 = arith.constant 1.250000e-01 : f32
    %504 = vector.broadcast %cst_255 : f32 to vector<8x1xf32>
    %505 = arith.mulf %503, %504 : vector<8x1xf32>
    %506 = arith.addf %442, %505 : vector<8x1xf32>
    %507 = arith.mulf %492, %492 : vector<8x4xf32>
    %cst_256 = arith.constant dense<0.000000e+00> : vector<8xf32>
    %508 = vector.multi_reduction <add>, %507, %cst_256 [1] : vector<8x4xf32> to vector<8xf32>
    %509 = vector.shape_cast %508 : vector<8xf32> to vector<8x1xf32>
    %cst_257 = arith.constant 5.000000e-01 : f32
    %510 = vector.broadcast %cst_257 : f32 to vector<8x1xf32>
    %511 = arith.mulf %510, %509 : vector<8x1xf32>
    %512 = arith.addf %506, %511 : vector<8x1xf32>
    %c0_258 = arith.constant 0 : index
    %c0_259 = arith.constant 0 : index
    %513 = vector.load %arg13[%c0_258, %c0_259] : memref<8x1xf32, #tpu.memory_space<vmem>>, vector<8x1xf32>
    tpu.vector_store %arg13[%c0_258, %c0_259], %512 {strides = array<i32>} : memref<8x1xf32, #tpu.memory_space<vmem>>, vector<8x1xf32>,
    return
  }
}

</mosaic_0001>

<bundles_post_ra>
// kernel: common_noise_forward.1
= control target key start
LH: loop header
LB: loop body
LE: loop exit
PB: predicated region body
PF: predicated region fallthrough
CT: control target
= control target key end

     0   :  { %vm67_vm0 = vcmask 1043456   ;;  %vm59_vm1 = vcmask 31744   ;;  %v3547_v0 = vmov 0.0   ;;  %vm3548_vm2 = vmmov 0   ;;  %s4203_s1 = inlined_call_operand.vmem [shape: f32[4,64], index: 1, kind: input, shape index: {}]   ;;  %s4204_s0 = inlined_call_operand.vmem [shape: f32[4,64], index: 0, kind: input, shape index: {}]   ;;  %s4205_s4 = inlined_call_operand.vmem [shape: f32[64,32], index: 4, kind: input, shape index: {}]   ;;  %s4206_s10 = inlined_call_operand.vmem [shape: f32[8,8,4], index: 10, kind: output, shape index: {0}]   ;;  %s4207_s12 = inlined_call_operand.vmem [shape: f32[8,8,4], index: 12, kind: output, shape index: {2}]   ;;  %s4208_s6 = inlined_call_operand.vmem [shape: f32[32,4], index: 6, kind: input, shape index: {}]   ;;  %s4209_s2 = inlined_call_operand.vmem [shape: f32[1,64], index: 2, kind: input, shape index: {}]   ;;  %s4210_s3 = inlined_call_operand.vmem [shape: f32[1,64], index: 3, kind: input, shape index: {}]   ;;  %s4211_s5 = inlined_call_operand.vmem [shape: f32[1,32], index: 5, kind: input, shape index: {}]   ;;  %s4212_s7 = inlined_call_operand.vmem [shape: f32[1,4], index: 7, kind: input, shape index: {}]   ;;  %s4213_s8 = inlined_call_operand.vmem [shape: f32[8,8,4], index: 8, kind: input, shape index: {}]   ;;  %s4214_s9 = inlined_call_operand.vmem [shape: f32[8,8,4], index: 9, kind: input, shape index: {}]   ;;  %s4215_s11 = inlined_call_operand.vmem [shape: f32[8,8,4], index: 11, kind: output, shape index: {1}]   ;;  %s4216_s13 = inlined_call_operand.vmem [shape: f32[8,1], index: 13, kind: output, shape index: {3}]  }
   0x1   :  { %3078 = vmatprep.subr.mxu1 %v3547_v0  ;;  %v3625_v1 = vld [vmem:[%s4203_s1] sm:$0xf]  ;;  %3080 = vmatprep.mubr.msk.f32.mxu1 %vm3548_vm2, %v3547_v0  ;;  %v3549_v3 = vmov 0.5   ;;  %v3550_v4 = vmov 0.0|0.0   ;;  %v44_v6 = vld [vmem:[%s4205_s4 + $0x8] sm:$0xff]  ;;  %v45_v8 = vld [vmem:[%s4205_s4 + $0x10] sm:$0xff]  ;;  %v141_v20 = vlaneseq }
   0x2   :  { %v3632_v2 = vld [vmem:[%s4204_s0] sm:$0xf]  ;;  %3079 = vmatpush3.msk.msra.mxu1 %vm67_vm0, %v3625_v1  ;;  %60 = vst.msk [vmem:[%s4206_s10] sm:$0xff] %vm59_vm1, %v3549_v3  ;;  %61 = vst.msk [vmem:[%s4207_s12] sm:$0xff] %vm59_vm1, %v3549_v3  ;;  %3398 = vmatprep.subr.bf16.mxu0 %v3550_v4  ;;  %v46_v9 = vld [vmem:[%s4205_s4 + $0x18] sm:$0xff]  ;;  %vm235_vm3 = vcmask 523264  }
   0x3   :  { %v43_v5 = vld [vmem:[%s4205_s4] sm:$0xff]  ;;  %3081 = vmatmul.mubr.msk.f32.vlgmr.msra.gmra.mrb[0].mxu1 %vm59_vm1, %v3549_v3  ;;  %3083 = vmatprep.subr.mxu1 %v3547_v0  ;;  %v3674_v10 = vpack.c.bf16 %v46_v9, %v45_v8  ;;  %v48_v12 = vld [vmem:[%s4205_s4 + $0x28] sm:$0xff]  ;;  %v49_v14 = vld [vmem:[%s4205_s4 + $0x30] sm:$0xff]  ;;  %v142_v22 = vshrl.u32 %v141_v20, 7  ;;  %vm316_vm4 = vcmask 261120   ;;  %vm2833_vm5 = vcmask 7168  }
   0x4   :  { %v3653_v7 = vpack.c.bf16 %v44_v6, %v43_v5  ;;  %3084 = vmatpush3.msk.msra.mxu1 %vm67_vm0, %v3632_v2  ;;  %3085 = vmatprep.mubr.msk.f32.mxu1 %vm3548_vm2, %v3547_v0  ;;  %v47_v11 = vld [vmem:[%s4205_s4 + $0x20] sm:$0xff]  ;;  %v50_v15 = vld [vmem:[%s4205_s4 + $0x38] sm:$0xff]  ;;  %v53_v18 = vld [vmem:[%s4208_s6 + $0x8] sm:$0xff] }
   0x5   :  { %3104 = vmatprep.mubr.msk.f32.mxu0 %vm3548_vm2, %v3547_v0  ;;  %3410 = vmatprep.subr.bf16.mxu1 %v3550_v4  ;;  %v3684_v13 = vpack.c.bf16 %v48_v12, %v47_v11  ;;  %v3694_v16 = vpack.c.bf16 %v50_v15, %v49_v14  ;;  %v52_v17 = vld [vmem:[%s4208_s6] sm:$0xff]  ;;  %v3719_v25 = vsub.s32 0, %v142_v22  ;;  %v54_v36 = vld [vmem:[%s4208_s6 + $0x10] sm:$0xff]  ;;  %v55_v37 = vld [vmem:[%s4208_s6 + $0x18] sm:$0xff] }
   0x6   :  { %3400 = vmatpush3.bf16.msra.mxu0 %v3653_v7  ;;  %399 = vadd.xlane.f32.xlu0 %v3547_v0  ;;  %v3704_v19 = vpack.c.bf16 %v53_v18, %v52_v17  ;;  %v3711_v21 = vld [vmem:[%s4209_s2] sm:$0x1]  ;;  %v3741_v38 = vpack.c.bf16 %v55_v37, %v54_v36  ;;  %v2868_v36 = vld [vmem:[%s4213_s8 + $0x8] sm:$0xff] }
   0x7   :  { %3401 = vmatprep.subr.bf16.mxu0 %v3550_v4  ;;  %3086 = vmatmul.mubr.msk.f32.vlgmr.msra.gmra.mrb[2].mxu1 %vm59_vm1, %v3549_v3  ;;  %v62_v23 = vmul.f32 0.0, %v3711_v21  ;;  %v3717_v24 = vld [vmem:[%s4210_s3] sm:$0x1]  ;;  %v427_v11 = vmul.f32 0.125, %v3711_v21 }
   0x8   :  { %3115 = vmatprep.mubr.msk.f32.mxu1 %vm3548_vm2, %v3547_v0  ;;  %3412 = vmatpush3.bf16.msra.mxu1 %v3704_v19  ;;  %v3748_v39 = vld [vmem:[%s4211_s5] ss:$0 sm:$0xff] }
   0x9   :  { %3413 = vmatprep.subr.bf16.mxu1 %v3550_v4  ;;  %v63_v26 = vadd.f32 %v62_v23, %v3717_v24  ;;  %v3760_v44 = vld [vmem:[%s4212_s7] ss:$0 sm:$0xff]  ;;  %v428_v12 = vadd.f32 %v427_v11, %v3717_v24 }
   0xa   :  { %3403 = vmatpush3.bf16.msra.mxu0 %v3674_v10  ;;  %v409_v46 = vld [vmem:[%s4213_s8] sm:$0xff] }
   0xb   :  { %3404 = vmatprep.subr.bf16.mxu0 %v3550_v4  ;;  %v225_v30 = vrot.slane %v63_v26, %v3719_v25  ;;  %v412_v49 = vld [vmem:[%s4214_s9] sm:$0xff]  ;;  %v410_v51 = vmul.f32 0.1, %v409_v46  ;;  %v583_v18 = vrot.slane %v428_v12, %v3719_v25 }
   0xc   :  { %3415 = vmatpush3.bf16.msra.mxu1 %v3741_v38  ;;  %v413_v54 = vmul.f32 0.05, %v412_v49 }
   0xd   :  { %3118 = vmatprep.subr.mxu1 %v3547_v0 }
   0xe   :  { %3406 = vmatpush3.bf16.msra.mxu0 %v3684_v13 }
   0xf   :  { %3407 = vmatprep.subr.bf16.mxu0 %v3550_v4 }
  0x12   :  { %3409 = vmatpush3.bf16.msra.mxu0 %v3694_v16 }
  0x13   :  { %3416 = vmatprep.subr.bf16.mxu0 %v3550_v4 }
  0xd6   :  { %v137_v27 = vpop.f32.mrb[0].mxu1 }
  0xd7   :  { %v3082_v28 = vpop.f32.mrb[1].mxu1  ;;  %v144_v29 = vrot.slane %v137_v27, %v3719_v25 }
  0xda   :  { %v217_v31 = vpop.f32.mrb[2].mxu1 }
  0xdb   :  { %v218_v32 = vadd.f32 %v217_v31, %v144_v29  ;;  %v3087_v33 = vpop.f32.mrb[3].mxu1 }
  0xdd   :  { %v227_v34 = vadd.f32 %v225_v30, %v218_v32 }
  0xdf   :  { %v228_v35 = vmax.f32 %v227_v34, 0.0 }
  0xe1   :  { %3105 = vmatmul.mubr.msk.f32.vlgmr.msra.gmra.mrb[0].mxu0 %vm235_vm3, %v228_v35 }
  0xe2   :  { %3418 = vmatpush3.bf16.msra.mxu0 %v3653_v7  ;;  %3144 = vmatprep.mubr.msk.f32.mxu0 %vm3548_vm2, %v3547_v0 }
  0xe3   :  { %3419 = vmatprep.subr.bf16.mxu0 %v3550_v4 }
  0xe6   :  { %3421 = vmatpush3.bf16.msra.mxu0 %v3674_v10 }
  0xe7   :  { %3422 = vmatprep.subr.bf16.mxu0 %v3550_v4 }
  0xea   :  { %3424 = vmatpush3.bf16.msra.mxu0 %v3684_v13 }
  0xeb   :  { %3425 = vmatprep.subr.bf16.mxu0 %v3550_v4 }
  0xee   :  { %3427 = vmatpush3.bf16.msra.mxu0 %v3694_v16 }
  0xef   :  { %3434 = vmatprep.subr.bf16.mxu0 %v3550_v4 }
 0x1b4   :  { %v305_v40 = vpop.f32.mrb[0].mxu0 }
 0x1b5   :  { %v306_v41 = vadd.f32 %v3748_v39, %v305_v40  ;;  %v3106_v42 = vpop.f32.mrb[1].mxu0 }
 0x1b7   :  { %v309_v43 = vmax.f32 %v306_v41, 0.0  ;;  %v2869_v41 = vld [vmem:[%s4214_s9 + $0x8] sm:$0xff] }
 0x1b9   :  { %3116 = vmatmul.mubr.msk.f32.vlgmr.msra.gmra.mrb[4].mxu1 %vm316_vm4, %v309_v43  ;;  %v756_v43 = vmul.f32 0.1, %v2868_v36 }
 0x1ba   :  { %3119 = vmatpush3.msk.msra.mxu1 %vm67_vm0, %v3625_v1  ;;  %3120 = vmatprep.mubr.msk.f32.mxu1 %vm3548_vm2, %v3547_v0 }
 0x1bb   :  { %3123 = vmatprep.subr.mxu1 %v3547_v0 }
 0x28c   :  { %v386_v45 = vpop.f32.mrb[4].mxu1 }
 0x28d   :  { %v387_v47 = vadd.f32 %v3760_v44, %v386_v45  ;;  %v3117_v48 = vpop.f32.mrb[5].mxu1 }
 0x28f   :  { %390 = vst.msk [vmem:[%s4215_s11] sm:$0xff] %vm59_vm1, %v387_v47  ;;  %v407_v50 = vmul.f32 0.125, %v387_v47  ;;  %v392_v52 = vmul.f32 %v387_v47, %v387_v47  ;;  %v760_v47 = vmul.f32 0.05, %v2869_v41 }
 0x291   :  { %v408_v53 = vadd.f32 0.5, %v407_v50  ;;  %v393_v55 = vsel %vm59_vm1, %v392_v52, 0.0 }
 0x292   :  { %394 = vadd.xlane.f32.xlu0 %v393_v55 }
 0x293   :  { %v411_v56 = vadd.f32 %v410_v51, %v408_v53 }
 0x295   :  { %v3774_v57 = vadd.f32 %v413_v54, %v411_v56 }
 0x297   :  { %2859 = vst.msk [vmem:[%s4206_s10 + $0x8] sm:$0xff] %vm59_vm1, %v3774_v57  ;;  %v415_v58 = vsel %vm59_vm1, %v3774_v57, 0.0 }
 0x298   :  { %v416_v59 = vrot.slane %v415_v58, 4 }
 0x29a   :  { %v417_v60 = vadd.f32 %v416_v59, %v415_v58 }
 0x29c   :  { %v418_v61 = vrot.slane %v417_v60, 2 }
 0x29e   :  { %v419_v62 = vadd.f32 %v418_v61, %v417_v60  ;;  %v774_v61 = vmul.f32 0.25, %v3711_v21 }
 0x2a0   :  { %v420_v63 = vrot.slane %v419_v62, 1 }
 0x2a2   :  { %v421_v3 = vadd.f32 %v420_v63, %v419_v62  ;;  %v775_v62 = vadd.f32 %v774_v61, %v3717_v24 }
 0x2a4   :  { %v422_v5 = vmul.f32 0.125, %v421_v3 }
 0x2a6   :  { %2860 = vst.msk [vmem:[%s4207_s12 + $0x8] sm:$0xff] %vm59_vm1, %v422_v5  ;;  %3121 = vmatmul.mubr.msk.f32.vlgmr.msra.gmra.mrb[6].mxu1 %vm59_vm1, %v422_v5  ;;  %v736_v6 = vsub.f32 %v3774_v57, %v422_v5  ;;  %v750_v34 = vsub.f32 %v422_v5, %v3774_v57 }
 0x2a7   :  { %3124 = vmatpush3.msk.msra.mxu1 %vm67_vm0, %v3632_v2  ;;  %3125 = vmatprep.mubr.msk.f32.mxu1 %vm3548_vm2, %v3547_v0 }
 0x2a8   :  { %v742_v8 = vmul.f32 %v736_v6, %v736_v6  ;;  %3428 = vmatprep.subr.bf16.mxu1 %v3550_v4  ;;  %v930_v6 = vrot.slane %v775_v62, %v3719_v25 }
 0x2aa   :  { %3126 = vmatmul.mubr.msk.f32.vlgmr.msra.gmra.mrb[8].mxu1 %vm59_vm1, %v3774_v57  ;;  %v743_v9 = vsel %vm59_vm1, %v742_v8, 0.0 }
 0x2ab   :  { %744 = vadd.xlane.f32.xlu1 %v743_v9  ;;  %3430 = vmatpush3.bf16.msra.mxu1 %v3704_v19 }
 0x2ac   :  { %3431 = vmatprep.subr.bf16.mxu1 %v3550_v4  ;;  %3155 = vmatprep.mubr.msk.f32.mxu1 %vm3548_vm2, %v3547_v0 }
 0x2af   :  { %3433 = vmatpush3.bf16.msra.mxu1 %v3741_v38 }
 0x2b0   :  { %3158 = vmatprep.subr.mxu1 %v3547_v0 }
 0x379   :  { %v498_v14 = vpop.f32.mrb[6].mxu1 }
 0x37a   :  { %v3122_v15 = vpop.f32.mrb[7].mxu1  ;;  %v505_v17 = vrot.slane %v498_v14, %v3719_v25 }
 0x37d   :  { %v575_v20 = vpop.f32.mrb[8].mxu1 }
 0x37e   :  { %v576_v22 = vadd.f32 %v575_v20, %v505_v17  ;;  %v3127_v23 = vpop.f32.mrb[9].mxu1 }
 0x380   :  { %v585_v26 = vadd.f32 %v583_v18, %v576_v22 }
 0x382   :  { %v586_v27 = vmax.f32 %v585_v26, 0.0 }
 0x384   :  { %3145 = vmatmul.mubr.msk.f32.vlgmr.msra.gmra.mrb[2].mxu0 %vm235_vm3, %v586_v27 }
 0x385   :  { %3436 = vmatpush3.bf16.msra.mxu0 %v3653_v7  ;;  %3184 = vmatprep.mubr.msk.f32.mxu0 %vm3548_vm2, %v3547_v0 }
 0x386   :  { %3437 = vmatprep.subr.bf16.mxu0 %v3550_v4 }
 0x389   :  { %3439 = vmatpush3.bf16.msra.mxu0 %v3674_v10 }
 0x38a   :  { %3440 = vmatprep.subr.bf16.mxu0 %v3550_v4 }
 0x38d   :  { %3442 = vmatpush3.bf16.msra.mxu0 %v3684_v13 }
 0x38e   :  { %3443 = vmatprep.subr.bf16.mxu0 %v3550_v4 }
 0x391   :  { %3445 = vmatpush3.bf16.msra.mxu0 %v3694_v16 }
 0x392   :  { %3452 = vmatprep.subr.bf16.mxu0 %v3550_v4 }
 0x457   :  { %v656_v28 = vpop.f32.mrb[2].mxu0 }
 0x458   :  { %v657_v29 = vadd.f32 %v3748_v39, %v656_v28  ;;  %v3146_v30 = vpop.f32.mrb[3].mxu0  ;;  %v2879_v28 = vld [vmem:[%s4213_s8 + $0x10] sm:$0xff] }
 0x45a   :  { %v660_v31 = vmax.f32 %v657_v29, 0.0 }
 0x45c   :  { %3156 = vmatmul.mubr.msk.f32.vlgmr.msra.gmra.mrb[10].mxu1 %vm316_vm4, %v660_v31  ;;  %v2880_v31 = vld [vmem:[%s4214_s9 + $0x10] sm:$0xff] }
 0x45d   :  { %3159 = vmatpush3.msk.msra.mxu1 %vm67_vm0, %v3625_v1  ;;  %3160 = vmatprep.mubr.msk.f32.mxu1 %vm3548_vm2, %v3547_v0  ;;  %v1107_v36 = vmul.f32 0.05, %v2880_v31 }
 0x45e   :  { %3163 = vmatprep.subr.mxu1 %v3547_v0 }
 0x52f   :  { %v730_v32 = vpop.f32.mrb[10].mxu1 }
 0x530   :  { %v731_v33 = vadd.f32 %v3760_v44, %v730_v32  ;;  %v3157_v35 = vpop.f32.mrb[11].mxu1 }
 0x532   :  { %2867 = vst.msk [vmem:[%s4215_s11 + $0x8] sm:$0xff] %vm59_vm1, %v731_v33  ;;  %v751_v37 = vadd.f32 %v750_v34, %v731_v33  ;;  %v737_v40 = vmul.f32 %v731_v33, %v731_v33  ;;  %v1103_v33 = vmul.f32 0.1, %v2879_v28 }
 0x534   :  { %v752_v42 = vmul.f32 0.125, %v751_v37  ;;  %v738_v45 = vsel %vm59_vm1, %v737_v40, 0.0 }
 0x535   :  { %739 = vadd.xlane.f32.xlu1 %v738_v45 }
 0x536   :  { %v753_v46 = vadd.f32 %v752_v42, %v3774_v57 }
 0x538   :  { %v757_v48 = vadd.f32 %v756_v43, %v753_v46 }
 0x53a   :  { %v3839_v49 = vadd.f32 %v760_v47, %v757_v48 }
 0x53c   :  { %2870 = vst.msk [vmem:[%s4206_s10 + $0x10] sm:$0xff] %vm59_vm1, %v3839_v49  ;;  %v762_v50 = vsel %vm59_vm1, %v3839_v49, 0.0 }
 0x53d   :  { %v763_v51 = vrot.slane %v762_v50, 4 }
 0x53f   :  { %v764_v52 = vadd.f32 %v763_v51, %v762_v50 }
 0x541   :  { %v765_v53 = vrot.slane %v764_v52, 2 }
 0x543   :  { %v766_v54 = vadd.f32 %v765_v53, %v764_v52  ;;  %v1121_v53 = vmul.f32 0.375, %v3711_v21 }
 0x545   :  { %v767_v55 = vrot.slane %v766_v54, 1 }
 0x547   :  { %v768_v56 = vadd.f32 %v767_v55, %v766_v54  ;;  %v1122_v54 = vadd.f32 %v1121_v53, %v3717_v24 }
 0x549   :  { %v769_v57 = vmul.f32 0.125, %v768_v56 }
 0x54b   :  { %2871 = vst.msk [vmem:[%s4207_s12 + $0x10] sm:$0xff] %vm59_vm1, %v769_v57  ;;  %3161 = vmatmul.mubr.msk.f32.vlgmr.msra.gmra.mrb[12].mxu1 %vm59_vm1, %v769_v57  ;;  %v1083_v58 = vsub.f32 %v3839_v49, %v769_v57  ;;  %v1097_v26 = vsub.f32 %v769_v57, %v3839_v49 }
 0x54c   :  { %3164 = vmatpush3.msk.msra.mxu1 %vm67_vm0, %v3632_v2  ;;  %3165 = vmatprep.mubr.msk.f32.mxu1 %vm3548_vm2, %v3547_v0 }
 0x54d   :  { %v1089_v59 = vmul.f32 %v1083_v58, %v1083_v58  ;;  %3446 = vmatprep.subr.bf16.mxu1 %v3550_v4  ;;  %v1277_v58 = vrot.slane %v1122_v54, %v3719_v25 }
 0x54f   :  { %3166 = vmatmul.mubr.msk.f32.vlgmr.msra.gmra.mrb[14].mxu1 %vm59_vm1, %v3839_v49  ;;  %v1090_v60 = vsel %vm59_vm1, %v1089_v59, 0.0 }
 0x550   :  { %1091 = vadd.xlane.f32.xlu1 %v1090_v60  ;;  %3448 = vmatpush3.bf16.msra.mxu1 %v3704_v19 }
 0x551   :  { %3449 = vmatprep.subr.bf16.mxu1 %v3550_v4  ;;  %3195 = vmatprep.mubr.msk.f32.mxu1 %vm3548_vm2, %v3547_v0 }
 0x554   :  { %3451 = vmatpush3.bf16.msra.mxu1 %v3741_v38 }
 0x555   :  { %3198 = vmatprep.subr.mxu1 %v3547_v0 }
 0x61e   :  { %v845_v63 = vpop.f32.mrb[12].mxu1 }
 0x61f   :  { %v3162_v3 = vpop.f32.mrb[13].mxu1  ;;  %v852_v5 = vrot.slane %v845_v63, %v3719_v25 }
 0x622   :  { %v922_v8 = vpop.f32.mrb[14].mxu1 }
 0x623   :  { %v923_v9 = vadd.f32 %v922_v8, %v852_v5  ;;  %v3167_v11 = vpop.f32.mrb[15].mxu1 }
 0x625   :  { %v932_v12 = vadd.f32 %v930_v6, %v923_v9 }
 0x627   :  { %v933_v14 = vmax.f32 %v932_v12, 0.0 }
 0x629   :  { %3185 = vmatmul.mubr.msk.f32.vlgmr.msra.gmra.mrb[4].mxu0 %vm235_vm3, %v933_v14 }
 0x62a   :  { %3454 = vmatpush3.bf16.msra.mxu0 %v3653_v7  ;;  %3224 = vmatprep.mubr.msk.f32.mxu0 %vm3548_vm2, %v3547_v0 }
 0x62b   :  { %3455 = vmatprep.subr.bf16.mxu0 %v3550_v4 }
 0x62e   :  { %3457 = vmatpush3.bf16.msra.mxu0 %v3674_v10 }
 0x62f   :  { %3458 = vmatprep.subr.bf16.mxu0 %v3550_v4 }
 0x632   :  { %3460 = vmatpush3.bf16.msra.mxu0 %v3684_v13 }
 0x633   :  { %3461 = vmatprep.subr.bf16.mxu0 %v3550_v4 }
 0x636   :  { %3463 = vmatpush3.bf16.msra.mxu0 %v3694_v16 }
 0x637   :  { %3470 = vmatprep.subr.bf16.mxu0 %v3550_v4 }
 0x6fc   :  { %v1003_v15 = vpop.f32.mrb[4].mxu0 }
 0x6fd   :  { %v1004_v17 = vadd.f32 %v3748_v39, %v1003_v15  ;;  %v3186_v18 = vpop.f32.mrb[5].mxu0  ;;  %v2890_v15 = vld [vmem:[%s4213_s8 + $0x18] sm:$0xff] }
 0x6ff   :  { %v1007_v20 = vmax.f32 %v1004_v17, 0.0 }
 0x701   :  { %3196 = vmatmul.mubr.msk.f32.vlgmr.msra.gmra.mrb[16].mxu1 %vm316_vm4, %v1007_v20  ;;  %v2891_v20 = vld [vmem:[%s4214_s9 + $0x18] sm:$0xff] }
 0x702   :  { %3199 = vmatpush3.msk.msra.mxu1 %vm67_vm0, %v3625_v1  ;;  %3200 = vmatprep.mubr.msk.f32.mxu1 %vm3548_vm2, %v3547_v0  ;;  %v1454_v28 = vmul.f32 0.05, %v2891_v20 }
 0x703   :  { %3203 = vmatprep.subr.mxu1 %v3547_v0 }
 0x7d4   :  { %v1077_v22 = vpop.f32.mrb[16].mxu1 }
 0x7d5   :  { %v1078_v23 = vadd.f32 %v3760_v44, %v1077_v22  ;;  %v3197_v27 = vpop.f32.mrb[17].mxu1 }
 0x7d7   :  { %2878 = vst.msk [vmem:[%s4215_s11 + $0x10] sm:$0xff] %vm59_vm1, %v1078_v23  ;;  %v1098_v29 = vadd.f32 %v1097_v26, %v1078_v23  ;;  %v1084_v30 = vmul.f32 %v1078_v23, %v1078_v23  ;;  %v1450_v23 = vmul.f32 0.1, %v2890_v15 }
 0x7d9   :  { %v1099_v32 = vmul.f32 0.125, %v1098_v29  ;;  %v1085_v34 = vsel %vm59_vm1, %v1084_v30, 0.0 }
 0x7da   :  { %1086 = vadd.xlane.f32.xlu0 %v1085_v34 }
 0x7db   :  { %v1100_v35 = vadd.f32 %v1099_v32, %v3839_v49 }
 0x7dd   :  { %v1104_v37 = vadd.f32 %v1103_v33, %v1100_v35 }
 0x7df   :  { %v3904_v40 = vadd.f32 %v1107_v36, %v1104_v37 }
 0x7e1   :  { %2881 = vst.msk [vmem:[%s4206_s10 + $0x18] sm:$0xff] %vm59_vm1, %v3904_v40  ;;  %v1109_v41 = vsel %vm59_vm1, %v3904_v40, 0.0 }
 0x7e2   :  { %v1110_v42 = vrot.slane %v1109_v41, 4 }
 0x7e4   :  { %v1111_v43 = vadd.f32 %v1110_v42, %v1109_v41 }
 0x7e6   :  { %v1112_v45 = vrot.slane %v1111_v43, 2 }
 0x7e8   :  { %v1113_v46 = vadd.f32 %v1112_v45, %v1111_v43  ;;  %v1468_v45 = vmul.f32 0.5, %v3711_v21 }
 0x7ea   :  { %v1114_v47 = vrot.slane %v1113_v46, 1 }
 0x7ec   :  { %v1115_v48 = vadd.f32 %v1114_v47, %v1113_v46  ;;  %v1469_v46 = vadd.f32 %v1468_v45, %v3717_v24 }
 0x7ee   :  { %v1116_v49 = vmul.f32 0.125, %v1115_v48 }
 0x7f0   :  { %2882 = vst.msk [vmem:[%s4207_s12 + $0x18] sm:$0xff] %vm59_vm1, %v1116_v49  ;;  %3201 = vmatmul.mubr.msk.f32.vlgmr.msra.gmra.mrb[18].mxu1 %vm59_vm1, %v1116_v49  ;;  %v1430_v50 = vsub.f32 %v3904_v40, %v1116_v49  ;;  %v1444_v12 = vsub.f32 %v1116_v49, %v3904_v40 }
 0x7f1   :  { %3204 = vmatpush3.msk.msra.mxu1 %vm67_vm0, %v3632_v2  ;;  %3205 = vmatprep.mubr.msk.f32.mxu1 %vm3548_vm2, %v3547_v0 }
 0x7f2   :  { %v1436_v51 = vmul.f32 %v1430_v50, %v1430_v50  ;;  %3464 = vmatprep.subr.bf16.mxu1 %v3550_v4  ;;  %v1624_v50 = vrot.slane %v1469_v46, %v3719_v25 }
 0x7f4   :  { %3206 = vmatmul.mubr.msk.f32.vlgmr.msra.gmra.mrb[20].mxu1 %vm59_vm1, %v3904_v40  ;;  %v1437_v52 = vsel %vm59_vm1, %v1436_v51, 0.0 }
 0x7f5   :  { %1438 = vadd.xlane.f32.xlu1 %v1437_v52  ;;  %3466 = vmatpush3.bf16.msra.mxu1 %v3704_v19 }
 0x7f6   :  { %3467 = vmatprep.subr.bf16.mxu1 %v3550_v4  ;;  %3235 = vmatprep.mubr.msk.f32.mxu1 %vm3548_vm2, %v3547_v0 }
 0x7f9   :  { %3469 = vmatpush3.bf16.msra.mxu1 %v3741_v38 }
 0x7fa   :  { %3238 = vmatprep.subr.mxu1 %v3547_v0 }
 0x8c3   :  { %v1192_v55 = vpop.f32.mrb[18].mxu1 }
 0x8c4   :  { %v3202_v56 = vpop.f32.mrb[19].mxu1  ;;  %v1199_v57 = vrot.slane %v1192_v55, %v3719_v25 }
 0x8c7   :  { %v1269_v59 = vpop.f32.mrb[20].mxu1 }
 0x8c8   :  { %v1270_v60 = vadd.f32 %v1269_v59, %v1199_v57  ;;  %v3207_v61 = vpop.f32.mrb[21].mxu1 }
 0x8ca   :  { %v1279_v62 = vadd.f32 %v1277_v58, %v1270_v60 }
 0x8cc   :  { %v1280_v63 = vmax.f32 %v1279_v62, 0.0 }
 0x8ce   :  { %3225 = vmatmul.mubr.msk.f32.vlgmr.msra.gmra.mrb[6].mxu0 %vm235_vm3, %v1280_v63 }
 0x8cf   :  { %3472 = vmatpush3.bf16.msra.mxu0 %v3653_v7  ;;  %3264 = vmatprep.mubr.msk.f32.mxu0 %vm3548_vm2, %v3547_v0 }
 0x8d0   :  { %3473 = vmatprep.subr.bf16.mxu0 %v3550_v4 }
 0x8d3   :  { %3475 = vmatpush3.bf16.msra.mxu0 %v3674_v10 }
 0x8d4   :  { %3476 = vmatprep.subr.bf16.mxu0 %v3550_v4 }
 0x8d7   :  { %3478 = vmatpush3.bf16.msra.mxu0 %v3684_v13 }
 0x8d8   :  { %3479 = vmatprep.subr.bf16.mxu0 %v3550_v4 }
 0x8db   :  { %3481 = vmatpush3.bf16.msra.mxu0 %v3694_v16 }
 0x8dc   :  { %3488 = vmatprep.subr.bf16.mxu0 %v3550_v4 }
 0x9a1   :  { %v1350_v3 = vpop.f32.mrb[6].mxu0 }
 0x9a2   :  { %v1351_v5 = vadd.f32 %v3748_v39, %v1350_v3  ;;  %v3226_v6 = vpop.f32.mrb[7].mxu0  ;;  %v2901_v3 = vld [vmem:[%s4213_s8 + $0x20] sm:$0xff] }
 0x9a4   :  { %v1354_v8 = vmax.f32 %v1351_v5, 0.0 }
 0x9a6   :  { %3236 = vmatmul.mubr.msk.f32.vlgmr.msra.gmra.mrb[22].mxu1 %vm316_vm4, %v1354_v8  ;;  %v2902_v8 = vld [vmem:[%s4214_s9 + $0x20] sm:$0xff] }
 0x9a7   :  { %3239 = vmatpush3.msk.msra.mxu1 %vm67_vm0, %v3625_v1  ;;  %3240 = vmatprep.mubr.msk.f32.mxu1 %vm3548_vm2, %v3547_v0  ;;  %v1801_v15 = vmul.f32 0.05, %v2902_v8 }
 0x9a8   :  { %3243 = vmatprep.subr.mxu1 %v3547_v0 }
 0xa79   :  { %v1424_v9 = vpop.f32.mrb[22].mxu1 }
 0xa7a   :  { %v1425_v11 = vadd.f32 %v3760_v44, %v1424_v9  ;;  %v3237_v14 = vpop.f32.mrb[23].mxu1 }
 0xa7c   :  { %2889 = vst.msk [vmem:[%s4215_s11 + $0x18] sm:$0xff] %vm59_vm1, %v1425_v11  ;;  %v1445_v17 = vadd.f32 %v1444_v12, %v1425_v11  ;;  %v1431_v18 = vmul.f32 %v1425_v11, %v1425_v11  ;;  %v1797_v11 = vmul.f32 0.1, %v2901_v3 }
 0xa7e   :  { %v1446_v22 = vmul.f32 0.125, %v1445_v17  ;;  %v1432_v26 = vsel %vm59_vm1, %v1431_v18, 0.0 }
 0xa7f   :  { %1433 = vadd.xlane.f32.xlu0 %v1432_v26 }
 0xa80   :  { %v1447_v27 = vadd.f32 %v1446_v22, %v3904_v40 }
 0xa82   :  { %v1451_v29 = vadd.f32 %v1450_v23, %v1447_v27 }
 0xa84   :  { %v3969_v30 = vadd.f32 %v1454_v28, %v1451_v29 }
 0xa86   :  { %2892 = vst.msk [vmem:[%s4206_s10 + $0x20] sm:$0xff] %vm59_vm1, %v3969_v30  ;;  %v1456_v31 = vsel %vm59_vm1, %v3969_v30, 0.0 }
 0xa87   :  { %v1457_v32 = vrot.slane %v1456_v31, 4 }
 0xa89   :  { %v1458_v33 = vadd.f32 %v1457_v32, %v1456_v31 }
 0xa8b   :  { %v1459_v34 = vrot.slane %v1458_v33, 2 }
 0xa8d   :  { %v1460_v35 = vadd.f32 %v1459_v34, %v1458_v33  ;;  %v1815_v34 = vmul.f32 0.625, %v3711_v21 }
 0xa8f   :  { %v1461_v36 = vrot.slane %v1460_v35, 1 }
 0xa91   :  { %v1462_v37 = vadd.f32 %v1461_v36, %v1460_v35  ;;  %v1816_v35 = vadd.f32 %v1815_v34, %v3717_v24 }
 0xa93   :  { %v1463_v40 = vmul.f32 0.125, %v1462_v37 }
 0xa95   :  { %2893 = vst.msk [vmem:[%s4207_s12 + $0x20] sm:$0xff] %vm59_vm1, %v1463_v40  ;;  %3241 = vmatmul.mubr.msk.f32.vlgmr.msra.gmra.mrb[24].mxu1 %vm59_vm1, %v1463_v40  ;;  %v1777_v41 = vsub.f32 %v3969_v30, %v1463_v40  ;;  %v1791_v62 = vsub.f32 %v1463_v40, %v3969_v30 }
 0xa96   :  { %3244 = vmatpush3.msk.msra.mxu1 %vm67_vm0, %v3632_v2  ;;  %3245 = vmatprep.mubr.msk.f32.mxu1 %vm3548_vm2, %v3547_v0 }
 0xa97   :  { %v1783_v42 = vmul.f32 %v1777_v41, %v1777_v41  ;;  %3482 = vmatprep.subr.bf16.mxu1 %v3550_v4  ;;  %v1971_v41 = vrot.slane %v1816_v35, %v3719_v25 }
 0xa99   :  { %3246 = vmatmul.mubr.msk.f32.vlgmr.msra.gmra.mrb[26].mxu1 %vm59_vm1, %v3969_v30  ;;  %v1784_v43 = vsel %vm59_vm1, %v1783_v42, 0.0 }
 0xa9a   :  { %1785 = vadd.xlane.f32.xlu1 %v1784_v43  ;;  %3484 = vmatpush3.bf16.msra.mxu1 %v3704_v19 }
 0xa9b   :  { %3485 = vmatprep.subr.bf16.mxu1 %v3550_v4  ;;  %3275 = vmatprep.mubr.msk.f32.mxu1 %vm3548_vm2, %v3547_v0 }
 0xa9e   :  { %3487 = vmatpush3.bf16.msra.mxu1 %v3741_v38 }
 0xa9f   :  { %3278 = vmatprep.subr.mxu1 %v3547_v0 }
 0xb68   :  { %v1539_v47 = vpop.f32.mrb[24].mxu1 }
 0xb69   :  { %v3242_v48 = vpop.f32.mrb[25].mxu1  ;;  %v1546_v49 = vrot.slane %v1539_v47, %v3719_v25 }
 0xb6c   :  { %v1616_v51 = vpop.f32.mrb[26].mxu1 }
 0xb6d   :  { %v1617_v52 = vadd.f32 %v1616_v51, %v1546_v49  ;;  %v3247_v53 = vpop.f32.mrb[27].mxu1 }
 0xb6f   :  { %v1626_v54 = vadd.f32 %v1624_v50, %v1617_v52 }
 0xb71   :  { %v1627_v55 = vmax.f32 %v1626_v54, 0.0 }
 0xb73   :  { %3265 = vmatmul.mubr.msk.f32.vlgmr.msra.gmra.mrb[8].mxu0 %vm235_vm3, %v1627_v55 }
 0xb74   :  { %3490 = vmatpush3.bf16.msra.mxu0 %v3653_v7  ;;  %3304 = vmatprep.mubr.msk.f32.mxu0 %vm3548_vm2, %v3547_v0 }
 0xb75   :  { %3491 = vmatprep.subr.bf16.mxu0 %v3550_v4 }
 0xb78   :  { %3493 = vmatpush3.bf16.msra.mxu0 %v3674_v10 }
 0xb79   :  { %3494 = vmatprep.subr.bf16.mxu0 %v3550_v4 }
 0xb7c   :  { %3496 = vmatpush3.bf16.msra.mxu0 %v3684_v13 }
 0xb7d   :  { %3497 = vmatprep.subr.bf16.mxu0 %v3550_v4 }
 0xb80   :  { %3499 = vmatpush3.bf16.msra.mxu0 %v3694_v16 }
 0xb81   :  { %3506 = vmatprep.subr.bf16.mxu0 %v3550_v4 }
 0xc46   :  { %v1697_v56 = vpop.f32.mrb[8].mxu0 }
 0xc47   :  { %v1698_v57 = vadd.f32 %v3748_v39, %v1697_v56  ;;  %v3266_v58 = vpop.f32.mrb[9].mxu0  ;;  %v2912_v56 = vld [vmem:[%s4213_s8 + $0x28] sm:$0xff] }
 0xc49   :  { %v1701_v59 = vmax.f32 %v1698_v57, 0.0 }
 0xc4b   :  { %3276 = vmatmul.mubr.msk.f32.vlgmr.msra.gmra.mrb[28].mxu1 %vm316_vm4, %v1701_v59  ;;  %v2913_v59 = vld [vmem:[%s4214_s9 + $0x28] sm:$0xff] }
 0xc4c   :  { %3279 = vmatpush3.msk.msra.mxu1 %vm67_vm0, %v3625_v1  ;;  %3280 = vmatprep.mubr.msk.f32.mxu1 %vm3548_vm2, %v3547_v0  ;;  %v2148_v3 = vmul.f32 0.05, %v2913_v59 }
 0xc4d   :  { %3283 = vmatprep.subr.mxu1 %v3547_v0 }
 0xd1e   :  { %v1771_v60 = vpop.f32.mrb[28].mxu1 }
 0xd1f   :  { %v1772_v61 = vadd.f32 %v3760_v44, %v1771_v60  ;;  %v3277_v63 = vpop.f32.mrb[29].mxu1 }
 0xd21   :  { %2900 = vst.msk [vmem:[%s4215_s11 + $0x20] sm:$0xff] %vm59_vm1, %v1772_v61  ;;  %v1792_v5 = vadd.f32 %v1791_v62, %v1772_v61  ;;  %v1778_v6 = vmul.f32 %v1772_v61, %v1772_v61  ;;  %v2144_v61 = vmul.f32 0.1, %v2912_v56 }
 0xd23   :  { %v1793_v9 = vmul.f32 0.125, %v1792_v5  ;;  %v1779_v12 = vsel %vm59_vm1, %v1778_v6, 0.0 }
 0xd24   :  { %1780 = vadd.xlane.f32.xlu0 %v1779_v12 }
 0xd25   :  { %v1794_v14 = vadd.f32 %v1793_v9, %v3969_v30 }
 0xd27   :  { %v1798_v17 = vadd.f32 %v1797_v11, %v1794_v14 }
 0xd29   :  { %v4034_v18 = vadd.f32 %v1801_v15, %v1798_v17 }
 0xd2b   :  { %2903 = vst.msk [vmem:[%s4206_s10 + $0x28] sm:$0xff] %vm59_vm1, %v4034_v18  ;;  %v1803_v20 = vsel %vm59_vm1, %v4034_v18, 0.0 }
 0xd2c   :  { %v1804_v22 = vrot.slane %v1803_v20, 4 }
 0xd2e   :  { %v1805_v23 = vadd.f32 %v1804_v22, %v1803_v20 }
 0xd30   :  { %v1806_v26 = vrot.slane %v1805_v23, 2 }
 0xd32   :  { %v1807_v27 = vadd.f32 %v1806_v26, %v1805_v23 }
 0xd34   :  { %v1808_v28 = vrot.slane %v1807_v27, 1 }
 0xd36   :  { %v1809_v29 = vadd.f32 %v1808_v28, %v1807_v27 }
 0xd38   :  { %v1810_v30 = vmul.f32 0.125, %v1809_v29 }
 0xd3a   :  { %2904 = vst.msk [vmem:[%s4207_s12 + $0x28] sm:$0xff] %vm59_vm1, %v1810_v30  ;;  %3281 = vmatmul.mubr.msk.f32.vlgmr.msra.gmra.mrb[30].mxu1 %vm59_vm1, %v1810_v30  ;;  %v2124_v31 = vsub.f32 %v4034_v18, %v1810_v30  ;;  %v2138_v54 = vsub.f32 %v1810_v30, %v4034_v18 }
 0xd3b   :  { %3284 = vmatpush3.msk.msra.mxu1 %vm67_vm0, %v3632_v2  ;;  %3285 = vmatprep.mubr.msk.f32.mxu1 %vm3548_vm2, %v3547_v0 }
 0xd3c   :  { %v2130_v32 = vmul.f32 %v2124_v31, %v2124_v31  ;;  %3500 = vmatprep.subr.bf16.mxu1 %v3550_v4 }
 0xd3e   :  { %3286 = vmatmul.mubr.msk.f32.vlgmr.msra.gmra.mrb[32].mxu1 %vm59_vm1, %v4034_v18  ;;  %v2131_v33 = vsel %vm59_vm1, %v2130_v32, 0.0 }
 0xd3f   :  { %2132 = vadd.xlane.f32.xlu1 %v2131_v33  ;;  %3502 = vmatpush3.bf16.msra.mxu1 %v3704_v19 }
 0xd40   :  { %3503 = vmatprep.subr.bf16.mxu1 %v3550_v4  ;;  %3315 = vmatprep.mubr.msk.f32.mxu1 %vm3548_vm2, %v3547_v0 }
 0xd43   :  { %3505 = vmatpush3.bf16.msra.mxu1 %v3741_v38 }
 0xd44   :  { %3318 = vmatprep.subr.mxu1 %v3547_v0 }
 0xe0d   :  { %v1886_v36 = vpop.f32.mrb[30].mxu1 }
 0xe0e   :  { %v3282_v37 = vpop.f32.mrb[31].mxu1  ;;  %v1893_v40 = vrot.slane %v1886_v36, %v3719_v25 }
 0xe11   :  { %v1963_v42 = vpop.f32.mrb[32].mxu1 }
 0xe12   :  { %v1964_v43 = vadd.f32 %v1963_v42, %v1893_v40  ;;  %v3287_v45 = vpop.f32.mrb[33].mxu1  ;;  %v2923_v42 = vld [vmem:[%s4213_s8 + $0x30] sm:$0xff] }
 0xe13   :  { %v2924_v45 = vld [vmem:[%s4214_s9 + $0x30] sm:$0xff] }
 0xe14   :  { %v1973_v46 = vadd.f32 %v1971_v41, %v1964_v43 }
 0xe16   :  { %v1974_v47 = vmax.f32 %v1973_v46, 0.0 }
 0xe18   :  { %3305 = vmatmul.mubr.msk.f32.vlgmr.msra.gmra.mrb[10].mxu0 %vm235_vm3, %v1974_v47  ;;  %v2491_v47 = vmul.f32 0.1, %v2923_v42 }
 0xe19   :  { %3508 = vmatpush3.bf16.msra.mxu0 %v3653_v7  ;;  %3344 = vmatprep.mubr.msk.f32.mxu0 %vm3548_vm2, %v3547_v0 }
 0xe1a   :  { %3509 = vmatprep.subr.bf16.mxu0 %v3550_v4 }
 0xe1d   :  { %3511 = vmatpush3.bf16.msra.mxu0 %v3674_v10 }
 0xe1e   :  { %3512 = vmatprep.subr.bf16.mxu0 %v3550_v4 }
 0xe21   :  { %3514 = vmatpush3.bf16.msra.mxu0 %v3684_v13 }
 0xe22   :  { %3515 = vmatprep.subr.bf16.mxu0 %v3550_v4 }
 0xe25   :  { %3517 = vmatpush3.bf16.msra.mxu0 %v3694_v16 }
 0xe26   :  { %3524 = vmatprep.subr.bf16.mxu0 %v3550_v4 }
 0xeeb   :  { %v2044_v48 = vpop.f32.mrb[10].mxu0 }
 0xeec   :  { %v2045_v49 = vadd.f32 %v3748_v39, %v2044_v48  ;;  %v3306_v50 = vpop.f32.mrb[11].mxu0 }
 0xeed   :  { %v2495_v50 = vmul.f32 0.05, %v2924_v45 }
 0xeee   :  { %v2048_v51 = vmax.f32 %v2045_v49, 0.0 }
 0xef0   :  { %3316 = vmatmul.mubr.msk.f32.vlgmr.msra.gmra.mrb[34].mxu1 %vm316_vm4, %v2048_v51 }
 0xef1   :  { %3319 = vmatpush3.msk.msra.mxu1 %vm67_vm0, %v3625_v1  ;;  %3320 = vmatprep.mubr.msk.f32.mxu1 %vm3548_vm2, %v3547_v0 }
 0xef2   :  { %3323 = vmatprep.subr.mxu1 %v3547_v0 }
 0xfc3   :  { %v2118_v52 = vpop.f32.mrb[34].mxu1 }
 0xfc4   :  { %v2119_v53 = vadd.f32 %v3760_v44, %v2118_v52  ;;  %v3317_v55 = vpop.f32.mrb[35].mxu1 }
 0xfc6   :  { %2911 = vst.msk [vmem:[%s4215_s11 + $0x28] sm:$0xff] %vm59_vm1, %v2119_v53  ;;  %v2139_v57 = vadd.f32 %v2138_v54, %v2119_v53  ;;  %v2125_v58 = vmul.f32 %v2119_v53, %v2119_v53 }
 0xfc8   :  { %v2140_v60 = vmul.f32 0.125, %v2139_v57  ;;  %v2126_v62 = vsel %vm59_vm1, %v2125_v58, 0.0 }
 0xfc9   :  { %2127 = vadd.xlane.f32.xlu0 %v2126_v62  ;;  %v3546_v62 = vld [vmem:[%s4204_s0] sm:$0xf] }
 0xfca   :  { %v2141_v63 = vadd.f32 %v2140_v60, %v4034_v18 }
 0xfcc   :  { %v2145_v5 = vadd.f32 %v2144_v61, %v2141_v63 }
 0xfce   :  { %v4099_v6 = vadd.f32 %v2148_v3, %v2145_v5  ;;  %v2509_v5 = vmul.f32 0.875, %v3711_v21 }
 0xfd0   :  { %2914 = vst.msk [vmem:[%s4206_s10 + $0x30] sm:$0xff] %vm59_vm1, %v4099_v6  ;;  %v2150_v8 = vsel %vm59_vm1, %v4099_v6, 0.0 }
 0xfd1   :  { %v2151_v9 = vrot.slane %v2150_v8, 4 }
 0xfd3   :  { %v2152_v11 = vadd.f32 %v2151_v9, %v2150_v8 }
 0xfd5   :  { %v2153_v12 = vrot.slane %v2152_v11, 2 }
 0xfd7   :  { %v2154_v14 = vadd.f32 %v2153_v12, %v2152_v11 }
 0xfd9   :  { %v2155_v15 = vrot.slane %v2154_v14, 1 }
 0xfdb   :  { %v2156_v17 = vadd.f32 %v2155_v15, %v2154_v14 }
 0xfdd   :  { %v2157_v18 = vmul.f32 0.125, %v2156_v17 }
 0xfdf   :  { %2915 = vst.msk [vmem:[%s4207_s12 + $0x30] sm:$0xff] %vm59_vm1, %v2157_v18  ;;  %3321 = vmatmul.mubr.msk.f32.vlgmr.msra.gmra.mrb[36].mxu1 %vm59_vm1, %v2157_v18  ;;  %v2471_v20 = vsub.f32 %v4099_v6, %v2157_v18 }
 0xfe0   :  { %3324 = vmatpush3.msk.msra.mxu1 %vm67_vm0, %v3632_v2  ;;  %3325 = vmatprep.mubr.msk.f32.mxu1 %vm3548_vm2, %v3547_v0  ;;  %v2162_v2 = vmul.f32 0.75, %v3711_v21 }
 0xfe1   :  { %v2477_v22 = vmul.f32 %v2471_v20, %v2471_v20  ;;  %3518 = vmatprep.subr.bf16.mxu1 %v3550_v4 }
 0xfe2   :  { %v2163_v26 = vadd.f32 %v2162_v2, %v3717_v24  ;;  %v400_v2 = vpop.xlane.xlu0 %399 }
 0xfe3   :  { %3326 = vmatmul.mubr.msk.f32.vlgmr.msra.gmra.mrb[38].mxu1 %vm59_vm1, %v4099_v6  ;;  %v2478_v23 = vsel %vm59_vm1, %v2477_v22, 0.0 }
 0xfe4   :  { %2479 = vadd.xlane.f32.xlu1 %v2478_v23  ;;  %3520 = vmatpush3.bf16.msra.mxu1 %v3704_v19  ;;  %v2318_v30 = vrot.slane %v2163_v26, %v3719_v25  ;;  %v745_v26 = vpop.xlane.xlu1 %744 }
 0xfe5   :  { %3521 = vmatprep.subr.bf16.mxu1 %v3550_v4  ;;  %3355 = vmatprep.mubr.msk.f32.mxu1 %vm3548_vm2, %v3547_v0 }
 0xfe8   :  { %3523 = vmatpush3.bf16.msra.mxu1 %v3741_v38 }
 0xfe9   :  { %3358 = vmatprep.subr.mxu1 %v3547_v0 }
0x10b2   :  { %v2233_v27 = vpop.f32.mrb[36].mxu1 }
0x10b3   :  { %v3322_v28 = vpop.f32.mrb[37].mxu1  ;;  %v2240_v29 = vrot.slane %v2233_v27, %v3719_v25  ;;  %v740_v27 = vpop.xlane.xlu1 %739 }
0x10b6   :  { %v2310_v31 = vpop.f32.mrb[38].mxu1 }
0x10b7   :  { %v2311_v32 = vadd.f32 %v2310_v31, %v2240_v29  ;;  %v3327_v33 = vpop.f32.mrb[39].mxu1  ;;  %v1092_v29 = vpop.xlane.xlu1 %1091 }
0x10b8   :  { %v401_v33 = vmul.f32 0.5, %v400_v2 }
0x10b9   :  { %v2320_v34 = vadd.f32 %v2318_v30, %v2311_v32 }
0x10bb   :  { %v2321_v35 = vmax.f32 %v2320_v34, 0.0  ;;  %v1439_v31 = vpop.xlane.xlu1 %1438 }
0x10bd   :  { %3345 = vmatmul.mubr.msk.f32.vlgmr.msra.gmra.mrb[12].mxu0 %vm235_vm3, %v2321_v35 }
0x10be   :  { %3526 = vmatpush3.bf16.msra.mxu0 %v3653_v7  ;;  %3384 = vmatprep.mubr.msk.f32.mxu0 %vm3548_vm2, %v3547_v0 }
0x10bf   :  { %3527 = vmatprep.subr.bf16.mxu0 %v3550_v4  ;;  %v1786_v35 = vpop.xlane.xlu1 %1785 }
0x10c2   :  { %3529 = vmatpush3.bf16.msra.mxu0 %v3674_v10 }
0x10c3   :  { %3530 = vmatprep.subr.bf16.mxu0 %v3550_v4 }
0x10c6   :  { %3532 = vmatpush3.bf16.msra.mxu0 %v3684_v13 }
0x10c7   :  { %3533 = vmatprep.subr.bf16.mxu0 %v3550_v4 }
0x10ca   :  { %3535 = vmatpush3.bf16.msra.mxu0 %v3694_v16  ;;  %v2485_v16 = vsub.f32 %v2157_v18, %v4099_v6 }
0x1190   :  { %v2391_v36 = vpop.f32.mrb[12].mxu0 }
0x1191   :  { %v2392_v37 = vadd.f32 %v3748_v39, %v2391_v36  ;;  %v3346_v40 = vpop.f32.mrb[13].mxu0  ;;  %v746_v36 = vmul.f32 0.5, %v745_v26 }
0x1193   :  { %v2395_v7 = vmax.f32 %v2392_v37, 0.0 }
0x1195   :  { %3356 = vmatmul.mubr.msk.f32.vlgmr.msra.gmra.mrb[40].mxu1 %vm316_vm4, %v2395_v7 }
0x1196   :  { %3359 = vmatpush3.msk.msra.mxu1 %vm67_vm0, %v3625_v1  ;;  %3360 = vmatprep.mubr.msk.f32.mxu1 %vm3548_vm2, %v3547_v0 }
0x1197   :  { %3363 = vmatprep.subr.mxu1 %v3547_v0 }
0x1268   :  { %v2465_v10 = vpop.f32.mrb[40].mxu1 }
0x1269   :  { %v2466_v13 = vadd.f32 %v3760_v44, %v2465_v10  ;;  %v3357_v41 = vpop.f32.mrb[41].mxu1  ;;  %v1093_v10 = vmul.f32 0.5, %v1092_v29 }
0x126a   :  { %v2133_v41 = vpop.xlane.xlu1 %2132 }
0x126b   :  { %2922 = vst.msk [vmem:[%s4215_s11 + $0x30] sm:$0xff] %vm59_vm1, %v2466_v13  ;;  %v2486_v1 = vadd.f32 %v2485_v16, %v2466_v13  ;;  %v2472_v43 = vmul.f32 %v2466_v13, %v2466_v13 }
0x126d   :  { %v2487_v46 = vmul.f32 0.125, %v2486_v1  ;;  %v2473_v48 = vsel %vm59_vm1, %v2472_v43, 0.0  ;;  %v1440_v1 = vmul.f32 0.5, %v1439_v31 }
0x126e   :  { %2474 = vadd.xlane.f32.xlu0 %v2473_v48  ;;  %v1787_v48 = vmul.f32 0.5, %v1786_v35 }
0x126f   :  { %v2488_v49 = vadd.f32 %v2487_v46, %v4099_v6  ;;  %v2510_v6 = vadd.f32 %v2509_v5, %v3717_v24 }
0x1271   :  { %v2492_v51 = vadd.f32 %v2491_v47, %v2488_v49  ;;  %v2665_v12 = vrot.slane %v2510_v6, %v3719_v25 }
0x1273   :  { %v2496_v52 = vadd.f32 %v2495_v50, %v2492_v51  ;;  %v2480_v51 = vpop.xlane.xlu1 %2479 }
0x1275   :  { %2925 = vst.msk [vmem:[%s4206_s10 + $0x38] sm:$0xff] %vm59_vm1, %v2496_v52  ;;  %v2497_v53 = vsel %vm59_vm1, %v2496_v52, 0.0 }
0x1276   :  { %v2498_v54 = vrot.slane %v2497_v53, 4 }
0x1278   :  { %v2499_v55 = vadd.f32 %v2498_v54, %v2497_v53  ;;  %v2134_v54 = vmul.f32 0.5, %v2133_v41 }
0x127a   :  { %v2500_v56 = vrot.slane %v2499_v55, 2 }
0x127c   :  { %v2501_v57 = vadd.f32 %v2500_v56, %v2499_v55 }
0x127e   :  { %v2502_v58 = vrot.slane %v2501_v57, 1 }
0x1280   :  { %v2503_v59 = vadd.f32 %v2502_v58, %v2501_v57 }
0x1282   :  { %v2504_v60 = vmul.f32 0.125, %v2503_v59  ;;  %v2481_v59 = vmul.f32 0.5, %v2480_v51 }
0x1284   :  { %2926 = vst.msk [vmem:[%s4207_s12 + $0x38] sm:$0xff] %vm59_vm1, %v2504_v60  ;;  %3361 = vmatmul.mubr.msk.f32.vlgmr.msra.gmra.mrb[42].mxu1 %vm59_vm1, %v2504_v60  ;;  %v2818_v61 = vsub.f32 %v2496_v52, %v2504_v60 }
0x1285   :  { %3364 = vmatpush3.msk.msra.mxu1 %vm67_vm0, %v3546_v62  ;;  %3365 = vmatprep.mubr.msk.f32.mxu1 %vm3548_vm2, %v3547_v0 }
0x1286   :  { %v2824_v63 = vmul.f32 %v2818_v61, %v2818_v61  ;;  %3536 = vmatprep.subr.bf16.mxu1 %v3550_v4 }
0x1288   :  { %3366 = vmatmul.mubr.msk.f32.vlgmr.msra.gmra.mrb[44].mxu1 %vm59_vm1, %v2496_v52  ;;  %v2825_v3 = vsel %vm59_vm1, %v2824_v63, 0.0 }
0x1289   :  { %2826 = vadd.xlane.f32.xlu1 %v2825_v3  ;;  %3538 = vmatpush3.bf16.msra.mxu1 %v3704_v19 }
0x128a   :  { %3539 = vmatprep.subr.bf16.mxu1 %v3550_v4  ;;  %3395 = vmatprep.mubr.msk.f32.mxu1 %vm3548_vm2, %v3547_v0 }
0x128d   :  { %3541 = vmatpush3.bf16.msra.mxu1 %v3741_v38 }
0x1316   :  { %v2827_v63 = vpop.xlane.xlu1 %2826 }
0x1357   :  { %v2580_v8 = vpop.f32.mrb[42].mxu1 }
0x1358   :  { %v3362_v9 = vpop.f32.mrb[43].mxu1  ;;  %v2587_v11 = vrot.slane %v2580_v8, %v3719_v25 }
0x135b   :  { %v2657_v14 = vpop.f32.mrb[44].mxu1 }
0x135c   :  { %v2658_v15 = vadd.f32 %v2657_v14, %v2587_v11  ;;  %v3367_v19 = vpop.f32.mrb[45].mxu1  ;;  %v2828_v11 = vmul.f32 0.5, %v2827_v63 }
0x135e   :  { %v2667_v17 = vadd.f32 %v2665_v12, %v2658_v15 }
0x1360   :  { %v2668_v4 = vmax.f32 %v2667_v17, 0.0 }
0x1362   :  { %3385 = vmatmul.mubr.msk.f32.vlgmr.msra.gmra.mrb[14].mxu0 %vm235_vm3, %v2668_v4 }
0x1435   :  { %v2738_v0 = vpop.f32.mrb[14].mxu0 }
0x1436   :  { %v2739_v38 = vadd.f32 %v3748_v39, %v2738_v0  ;;  %v3386_v18 = vpop.f32.mrb[15].mxu0  ;;  %v395_v39 = vpop.xlane.xlu0 %394 }
0x1437   :  { %v396_v34 = vmul.f32 0.5, %v395_v39 }
0x1438   :  { %v2742_v21 = vmax.f32 %v2739_v38, 0.0 }
0x1439   :  { %v402_v16 = vadd.f32 %v401_v33, %v396_v34 }
0x143a   :  { %3396 = vmatmul.mubr.msk.f32.vlgmr.msra.gmra.mrb[46].mxu1 %vm316_vm4, %v2742_v21  ;;  %v1087_v28 = vpop.xlane.xlu0 %1086 }
0x143b   :  { %v1088_v37 = vmul.f32 0.5, %v1087_v28  ;;  %v403_v50 = vmul.f32 0.125, %v402_v16 }
0x143d   :  { %v1094_v42 = vadd.f32 %v1093_v10, %v1088_v37 }
0x143e   :  { %v1434_v30 = vpop.xlane.xlu0 %1433 }
0x143f   :  { %v1435_v13 = vmul.f32 0.5, %v1434_v30  ;;  %v1095_v52 = vmul.f32 0.125, %v1094_v42 }
0x1441   :  { %v1441_v47 = vadd.f32 %v1440_v1, %v1435_v13 }
0x1442   :  { %v1781_v32 = vpop.xlane.xlu0 %1780 }
0x1443   :  { %v1782_v43 = vmul.f32 0.5, %v1781_v32  ;;  %v1442_v57 = vmul.f32 0.125, %v1441_v47 }
0x1445   :  { %v1788_v53 = vadd.f32 %v1787_v48, %v1782_v43 }
0x1446   :  { %v2128_v40 = vpop.xlane.xlu0 %2127 }
0x1447   :  { %v2129_v49 = vmul.f32 0.5, %v2128_v40  ;;  %v1789_v61 = vmul.f32 0.125, %v1788_v53 }
0x1449   :  { %v2135_v58 = vadd.f32 %v2134_v54, %v2129_v49 }
0x144a   :  { %v2475_v45 = vpop.xlane.xlu0 %2474 }
0x144b   :  { %v2476_v55 = vmul.f32 0.5, %v2475_v45  ;;  %v2136_v5 = vmul.f32 0.125, %v2135_v58 }
0x144d   :  { %v2482_v62 = vadd.f32 %v2481_v59, %v2476_v55 }
0x144f   :  { %v2483_v9 = vmul.f32 0.125, %v2482_v62 }
0x150d   :  { %v2812_v24 = vpop.f32.mrb[46].mxu1 }
0x150e   :  { %v2813_v20 = vadd.f32 %v3760_v44, %v2812_v24  ;;  %v3397_v22 = vpop.f32.mrb[47].mxu1  ;;  %v741_v44 = vmul.f32 0.5, %v740_v27 }
0x1510   :  { %2933 = vst.msk [vmem:[%s4215_s11 + $0x38] sm:$0xff] %vm59_vm1, %v2813_v20  ;;  %v2819_v25 = vmul.f32 %v2813_v20, %v2813_v20  ;;  %v747_v7 = vadd.f32 %v746_v36, %v741_v44 }
0x1512   :  { %v2820_v23 = vsel %vm59_vm1, %v2819_v25, 0.0  ;;  %v748_v46 = vmul.f32 0.125, %v747_v7 }
0x1513   :  { %2821 = vadd.xlane.f32.xlu0 %v2820_v23 }
0x1514   :  { %v749_v56 = vadd.f32 %v748_v46, %v403_v50 }
0x1516   :  { %v1096_v60 = vadd.f32 %v1095_v52, %v749_v56 }
0x1518   :  { %v1443_v3 = vadd.f32 %v1442_v57, %v1096_v60 }
0x151a   :  { %v1790_v8 = vadd.f32 %v1789_v61, %v1443_v3 }
0x151c   :  { %v2137_v14 = vadd.f32 %v2136_v5, %v1790_v8 }
0x151e   :  { %v2484_v19 = vadd.f32 %v2483_v9, %v2137_v14 }
0x15a0   :  { %v2822_v6 = vpop.xlane.xlu0 %2821 }
0x15a1   :  { %v2823_v12 = vmul.f32 0.5, %v2822_v6 }
0x15a3   :  { %v2829_v15 = vadd.f32 %v2828_v11, %v2823_v12 }
0x15a5   :  { %v2830_v17 = vmul.f32 0.125, %v2829_v15 }
0x15a7   :  { %v2831_v4 = vadd.f32 %v2830_v17, %v2484_v19 }
0x15a9   :  { %v2832_v0 = vadd.f32 %v2831_v4, %v2828_v11 }
0x15ab   :  { %2834 = vst.msk [vmem:[%s4216_s13] sm:$0xff] %vm2833_vm5, %v2832_v0 }

</bundles_post_ra>
